<compile_context>
chip_gen: v5e
topology: v5e:2x2
jax: 0.10.0
libtpu: 0.0.40
codegen_flags: <defaults>
</compile_context>

<pallas_src>
import functools

import jax
import jax.numpy as jnp
import numpy as np
from jax.experimental import pallas as pl
from jax.experimental.pallas import tpu as pltpu


# ----------------------------------------------------------------------------
# Constant 0/1 pool-select (+ optional scatter-into-padded-grid) matrix.
# Rows index the flat (hp_in * wp_in) padded conv-output grid; each column
# picks the top-left anchor of one 2x2 pooling window (the 4-way shifted max
# has already been folded into that anchor inside the kernel).
# ----------------------------------------------------------------------------
def _pool_select_matrix(hp_in, wp_in, pad_out):
    hh, wh = (hp_in - 2) // 2, (wp_in - 2) // 2
    ho, wo = (hh + 2, wh + 2) if pad_out else (hh, wh)
    s = np.zeros((hp_in * wp_in, ho * wo), np.float32)
    for yo in range(hh):
        for xo in range(wh):
            src = (2 * yo + 1) * wp_in + (2 * xo + 1)
            dst = (yo + 1) * wo + (xo + 1) if pad_out else yo * wh + xo
            s[src, dst] = 1.0
    return s


# ----------------------------------------------------------------------------
# Fused kernel: conv3x3+ReLU+pool, conv3x3+ReLU+pool, both 1x1 heads.
# ----------------------------------------------------------------------------
def _fused_kernel(x_ref, w1_ref, b1_ref, w2_ref, b2_ref, wh_ref, bh_ref,
                  s1_ref, s2_ref, o_ref,
                  pad1_ref, pat1_ref, y1_ref, pad2_ref, pat2_ref, y2_ref,
                  *, bpb, wp1, wp2):
    cin, a1 = x_ref.shape[1], x_ref.shape[2]     # per-image padded area, stage 1
    c1 = w1_ref.shape[0]
    c2 = w2_ref.shape[0]
    a2 = s1_ref.shape[1]                         # per-image padded area, stage 2
    nf1, nf2 = bpb * a1, bpb * a2
    g1, g2 = wp1 + 1, wp2 + 1                    # guard widths for the tap slabs

    # Zero only the tiny guard / tail strips (not the whole scratch).  Done
    # every step so correctness does not depend on which TensorCore ran step 0
    # when the batch axis is split across cores.
    pad1_ref[:, pl.ds(0, g1)] = jnp.zeros((cin, g1), jnp.float32)
    pad1_ref[:, pl.ds(g1 + nf1, g1)] = jnp.zeros((cin, g1), jnp.float32)
    y1_ref[:, pl.ds(nf1, wp1 + 1)] = jnp.zeros((c1, wp1 + 1), jnp.float32)
    pad2_ref[:, pl.ds(0, g2)] = jnp.zeros((c1, g2), jnp.float32)
    pad2_ref[:, pl.ds(g2 + nf2, g2)] = jnp.zeros((c1, g2), jnp.float32)
    y2_ref[:, pl.ds(nf2, wp2 + 1)] = jnp.zeros((c2, wp2 + 1), jnp.float32)

    # ---- stage 1: SAME 3x3 conv (Cin -> C1) + ReLU, all bpb images at once --
    for b in range(bpb):                                     # lane-dense copies
        pad1_ref[:, pl.ds(g1 + b * a1, a1)] = x_ref[b]
    for t in range(9):                                       # contiguous tap slabs
        dy, dx = t // 3, t % 3
        off = (dy - 1) * wp1 + (dx - 1)
        pat1_ref[pl.ds(cin * t, cin), :] = pad1_ref[:, pl.ds(g1 + off, nf1)]
    y = jnp.dot(w1_ref[...], pat1_ref[...],
                preferred_element_type=jnp.float32) + b1_ref[...]
    y1_ref[:, pl.ds(0, nf1)] = jnp.maximum(y, 0.0)

    # ---- 2x2 max-pool + scatter into the zero-padded stage-2 grid ----------
    for b in range(bpb):
        c0 = b * a1
        m = jnp.maximum(
            jnp.maximum(y1_ref[:, pl.ds(c0, a1)], y1_ref[:, pl.ds(c0 + 1, a1)]),
            jnp.maximum(y1_ref[:, pl.ds(c0 + wp1, a1)],
                        y1_ref[:, pl.ds(c0 + wp1 + 1, a1)]))
        pad2_ref[:, pl.ds(g2 + b * a2, a2)] = jnp.dot(
            m, s1_ref[...], preferred_element_type=jnp.float32)

    # ---- stage 2: SAME 3x3 conv (C1 -> C2) + ReLU ---------------------------
    for t in range(9):
        dy, dx = t // 3, t % 3
        off = (dy - 1) * wp2 + (dx - 1)
        pat2_ref[pl.ds(c1 * t, c1), :] = pad2_ref[:, pl.ds(g2 + off, nf2)]
    y = jnp.dot(w2_ref[...], pat2_ref[...],
                preferred_element_type=jnp.float32) + b2_ref[...]
    y2_ref[:, pl.ds(0, nf2)] = jnp.maximum(y, 0.0)

    # ---- 2x2 max-pool + both 1x1 heads fused, per image ---------------------
    for b in range(bpb):
        c0 = b * a2
        m = jnp.maximum(
            jnp.maximum(y2_ref[:, pl.ds(c0, a2)], y2_ref[:, pl.ds(c0 + 1, a2)]),
            jnp.maximum(y2_ref[:, pl.ds(c0 + wp2, a2)],
                        y2_ref[:, pl.ds(c0 + wp2 + 1, a2)]))
        feat = jnp.dot(m, s2_ref[...], preferred_element_type=jnp.float32)
        o_ref[b] = jnp.dot(wh_ref[...], feat,
                           preferred_element_type=jnp.float32) + bh_ref[...]


# ----------------------------------------------------------------------------
# Public forward: NCHW in / NCHW out, like the PyTorch module.
# ----------------------------------------------------------------------------
def multi_task_forward(params, x_nchw):
    B, Cin, H, W = x_nchw.shape
    if H % 4 or W % 4:
        raise ValueError("H and W must be multiples of 4 (two exact 2x2 pools)")
    C1 = params["w1"].shape[-1]
    C2 = params["w2"].shape[-1]
    nc = params["ws"].shape[-1]
    Nh = 1 + nc
    Hh, Wh, Hq, Wq = H // 2, W // 2, H // 4, W // 4
    Hp1, Wp1, Hp2, Wp2 = H + 2, W + 2, Hh + 2, Wh + 2
    A1, A2 = Hp1 * Wp1, Hp2 * Wp2

    # Two grid blocks when possible (one per v7x TensorCore); otherwise the
    # whole batch in one step (amortizes the ~0.35us per-step overhead).
    steps = 2 if (B % 2 == 0 and B >= 2) else 1
    bpb = B // steps
    Nf1, Nf2 = bpb * A1, bpb * A2

    # SAME padding applied once here (a cheap pad, NOT a transpose/relayout);
    # collapsing (Hp1, Wp1) onto the lane dim is a free HBM reshape.
    xp = jnp.pad(x_nchw, ((0, 0), (0, 0), (1, 1), (1, 1))).reshape(B, Cin, A1)

    # im2col-flattened weights, channels-out on sublanes: K order = (tap, cin).
    w1m = params["w1"].reshape(9 * Cin, C1).T                       # (C1, 9*Cin)
    w2m = params["w2"].reshape(9 * C1, C2).T                        # (C2, 9*C1)
    whm = jnp.concatenate([params["wd"], params["ws"]], axis=-1).T  # (Nh, C2)
    b1 = params["b1"].reshape(C1, 1)
    b2 = params["b2"].reshape(C2, 1)
    bh = jnp.concatenate([params["bd"], params["bs"]], axis=0).reshape(Nh, 1)

    # Constant pool-select / scatter matrices (gather-by-matmul).
    s1 = jnp.asarray(_pool_select_matrix(Hp1, Wp1, pad_out=True))   # (A1, A2)
    s2 = jnp.asarray(_pool_select_matrix(Hp2, Wp2, pad_out=False))  # (A2, Hq*Wq)

    # Explicit VMEM budget from the per-block footprint (inputs double-buffered).
    f32 = 4
    scratch_bytes = f32 * (Cin * (2 * (Wp1 + 1) + Nf1) + 9 * Cin * Nf1
                           + C1 * (Nf1 + Wp1 + 1) + C1 * (2 * (Wp2 + 1) + Nf2)
                           + 9 * C1 * Nf2 + C2 * (Nf2 + Wp2 + 1))
    in_bytes = f32 * (bpb * Cin * A1 + C1 * 9 * Cin + C1 + C2 * 9 * C1 + C2
                      + Nh * C2 + Nh + A1 * A2 + A2 * Hq * Wq)
    out_bytes = f32 * bpb * Nh * Hq * Wq
    vmem_limit = int(min(96 * 2 ** 20,
                         max(32 * 2 ** 20,
                             2 * (scratch_bytes + 2 * in_bytes + 2 * out_bytes))))

    kernel = functools.partial(_fused_kernel, bpb=bpb, wp1=Wp1, wp2=Wp2)

    out = pl.pallas_call(
        kernel,
        out_shape=jax.ShapeDtypeStruct((B, Nh, Hq * Wq), jnp.float32),
        grid=(steps,),
        in_specs=[
            pl.BlockSpec((bpb, Cin, A1), lambda g: (g, 0, 0)),
            pl.BlockSpec((C1, 9 * Cin), lambda g: (0, 0)),
            pl.BlockSpec((C1, 1), lambda g: (0, 0)),
            pl.BlockSpec((C2, 9 * C1), lambda g: (0, 0)),
            pl.BlockSpec((C2, 1), lambda g: (0, 0)),
            pl.BlockSpec((Nh, C2), lambda g: (0, 0)),
            pl.BlockSpec((Nh, 1), lambda g: (0, 0)),
            pl.BlockSpec((A1, A2), lambda g: (0, 0)),
            pl.BlockSpec((A2, Hq * Wq), lambda g: (0, 0)),
        ],
        out_specs=pl.BlockSpec((bpb, Nh, Hq * Wq), lambda g: (g, 0, 0)),
        scratch_shapes=[
            pltpu.VMEM((Cin, 2 * (Wp1 + 1) + Nf1), jnp.float32),   # padded stage-1 grid
            pltpu.VMEM((9 * Cin, Nf1), jnp.float32),               # conv1 patches (K,spatial)
            pltpu.VMEM((C1, Nf1 + Wp1 + 1), jnp.float32),          # conv1+ReLU output
            pltpu.VMEM((C1, 2 * (Wp2 + 1) + Nf2), jnp.float32),    # padded stage-2 grid
            pltpu.VMEM((9 * C1, Nf2), jnp.float32),                # conv2 patches
            pltpu.VMEM((C2, Nf2 + Wp2 + 1), jnp.float32),          # conv2+ReLU output
        ],
        compiler_params=pltpu.CompilerParams(
            dimension_semantics=("parallel",),
            vmem_limit_bytes=vmem_limit),
    )(xp, w1m, b1, w2m, b2, whm, bh, s1, s2)

    # Output is already NCHW-ordered: only free reshapes + a tiny channel slice.
    depth = out[:, 0:1, :].reshape(B, 1, Hq, Wq)
    seg = out[:, 1:, :].reshape(B, nc, Hq, Wq)
    return {"depth": depth, "seg": seg}


# ----------------------------------------------------------------------------
# Pure-JAX reference for correctness checking.
# ----------------------------------------------------------------------------
def _ref_forward(params, x_nchw):
    x = jnp.transpose(x_nchw, (0, 2, 3, 1))

    def conv(x, w, b):
        y = jax.lax.conv_general_dilated(
            x, w, (1, 1), "SAME",
            dimension_numbers=("NHWC", "HWIO", "NHWC"))
        return jnp.maximum(y + b.reshape(1, 1, 1, -1), 0.0)

    def pool(x):
        return jax.lax.reduce_window(x, -jnp.inf, jax.lax.max,
                                     (1, 2, 2, 1), (1, 2, 2, 1), "VALID")

    f = pool(conv(x, params["w1"], params["b1"]))
    f = pool(conv(f, params["w2"], params["b2"]))
    d = jnp.einsum("bhwc,co->bhwo", f, params["wd"]) + params["bd"].reshape(1, 1, 1, -1)
    s = jnp.einsum("bhwc,co->bhwo", f, params["ws"]) + params["bs"].reshape(1, 1, 1, -1)
    return {"depth": jnp.transpose(d, (0, 3, 1, 2)),
            "seg": jnp.transpose(s, (0, 3, 1, 2))}


if __name__ == "__main__":
    num_classes = 5
    B, Cin, H, W = 2, 3, 16, 16

    key = jax.random.PRNGKey(0)
    keys = jax.random.split(key, 9)

    def uinit(k, shape, fan_in):
        bound = 1.0 / np.sqrt(fan_in)
        return jax.random.uniform(k, shape, jnp.float32, -bound, bound)

    # PyTorch-default-style init; conv weights in HWIO (the OIHW -> HWIO
    # conversion of real checkpoint weights would be `w.transpose(2, 3, 1, 0)`),
    # biases as flat (C,) vectors like nn.Conv2d.
    params = {
        "w1": uinit(keys[0], (3, 3, 3, 16), 3 * 3 * 3),
        "b1": uinit(keys[1], (16,), 3 * 3 * 3),
        "w2": uinit(keys[2], (3, 3, 16, 32), 16 * 3 * 3),
        "b2": uinit(keys[3], (32,), 16 * 3 * 3),
        "wd": uinit(keys[4], (32, 1), 32),
        "bd": uinit(keys[5], (1,), 32),
        "ws": uinit(keys[6], (32, num_classes), 32),
        "bs": uinit(keys[7], (num_classes,), 32),
    }

    x = jax.random.normal(keys[8], (B, Cin, H, W), jnp.float32)

    out = jax.block_until_ready(multi_task_forward(params, x))
    ref = jax.block_until_ready(_ref_forward(params, x))

    assert out["depth"].shape == (B, 1, H // 4, W // 4)
    assert out["seg"].shape == (B, num_classes, H // 4, W // 4)
    for k in ("depth", "seg"):
        np.testing.assert_allclose(np.asarray(out[k]), np.asarray(ref[k]),
                                   rtol=1e-3, atol=1e-3)
    print("KERNEL_OK")
</pallas_src>

<mosaic_0001>
module attributes {stable_mosaic.version = 11 : i64} {
  func.func @_fused_kernel(%arg0: i32, %arg1: memref<1x3x324xf32, #tpu.memory_space<vmem>>, %arg2: memref<16x27xf32, #tpu.memory_space<vmem>>, %arg3: memref<16x1xf32, #tpu.memory_space<vmem>>, %arg4: memref<32x144xf32, #tpu.memory_space<vmem>>, %arg5: memref<32x1xf32, #tpu.memory_space<vmem>>, %arg6: memref<6x32xf32, #tpu.memory_space<vmem>>, %arg7: memref<6x1xf32, #tpu.memory_space<vmem>>, %arg8: memref<324x100xf32, #tpu.memory_space<vmem>>, %arg9: memref<100x16xf32, #tpu.memory_space<vmem>>, %arg10: memref<1x6x16xf32, #tpu.memory_space<vmem>>, %arg11: memref<3x362xf32, #tpu.memory_space<vmem>>, %arg12: memref<27x324xf32, #tpu.memory_space<vmem>>, %arg13: memref<16x343xf32, #tpu.memory_space<vmem>>, %arg14: memref<16x122xf32, #tpu.memory_space<vmem>>, %arg15: memref<144x100xf32, #tpu.memory_space<vmem>>, %arg16: memref<32x111xf32, #tpu.memory_space<vmem>>) attributes {dimension_semantics = [#tpu.dimension_semantics<parallel>], iteration_bounds = array<i64: 2>, scalar_prefetch = 0 : i64, scratch_operands = 6 : i64, tpu.core_type = #tpu.core_type<tc>, window_params = [{transform_indices = @transform_0, window_bounds = array<i64: 1, 3, 324>}, {pipeline_mode = #tpu.pipeline_mode<synchronous>, transform_indices = @transform_1, window_bounds = array<i64: 16, 27>}, {pipeline_mode = #tpu.pipeline_mode<synchronous>, transform_indices = @transform_2, window_bounds = array<i64: 16, 1>}, {pipeline_mode = #tpu.pipeline_mode<synchronous>, transform_indices = @transform_3, window_bounds = array<i64: 32, 144>}, {pipeline_mode = #tpu.pipeline_mode<synchronous>, transform_indices = @transform_4, window_bounds = array<i64: 32, 1>}, {pipeline_mode = #tpu.pipeline_mode<synchronous>, transform_indices = @transform_5, window_bounds = array<i64: 6, 32>}, {pipeline_mode = #tpu.pipeline_mode<synchronous>, transform_indices = @transform_6, window_bounds = array<i64: 6, 1>}, {pipeline_mode = #tpu.pipeline_mode<synchronous>, transform_indices = @transform_7, window_bounds = array<i64: 324, 100>}, {pipeline_mode = #tpu.pipeline_mode<synchronous>, transform_indices = @transform_8, window_bounds = array<i64: 100, 16>}, {transform_indices = @transform_9, window_bounds = array<i64: 1, 6, 16>}]} {
    %cst = arith.constant 0.000000e+00 : f32
    %0 = vector.broadcast %cst : f32 to vector<3x19xf32>
    %c0 = arith.constant 0 : index
    %c0_0 = arith.constant 0 : index
    %1 = vector.load %arg11[%c0, %c0_0] : memref<3x362xf32, #tpu.memory_space<vmem>>, vector<3x19xf32>
    tpu.vector_store %arg11[%c0, %c0_0], %0 {strides = array<i32>} : memref<3x362xf32, #tpu.memory_space<vmem>>, vector<3x19xf32>,
    %cst_1 = arith.constant 0.000000e+00 : f32
    %2 = vector.broadcast %cst_1 : f32 to vector<3x19xf32>
    %c0_2 = arith.constant 0 : index
    %c343 = arith.constant 343 : index
    %3 = vector.load %arg11[%c0_2, %c343] : memref<3x362xf32, #tpu.memory_space<vmem>>, vector<3x19xf32>
    tpu.vector_store %arg11[%c0_2, %c343], %2 {strides = array<i32>} : memref<3x362xf32, #tpu.memory_space<vmem>>, vector<3x19xf32>,
    %cst_3 = arith.constant 0.000000e+00 : f32
    %4 = vector.broadcast %cst_3 : f32 to vector<16x19xf32>
    %c0_4 = arith.constant 0 : index
    %c324 = arith.constant 324 : index
    %5 = vector.load %arg13[%c0_4, %c324] : memref<16x343xf32, #tpu.memory_space<vmem>>, vector<16x19xf32>
    tpu.vector_store %arg13[%c0_4, %c324], %4 {strides = array<i32>} : memref<16x343xf32, #tpu.memory_space<vmem>>, vector<16x19xf32>,
    %cst_5 = arith.constant 0.000000e+00 : f32
    %6 = vector.broadcast %cst_5 : f32 to vector<16x11xf32>
    %c0_6 = arith.constant 0 : index
    %c0_7 = arith.constant 0 : index
    %7 = vector.load %arg14[%c0_6, %c0_7] : memref<16x122xf32, #tpu.memory_space<vmem>>, vector<16x11xf32>
    tpu.vector_store %arg14[%c0_6, %c0_7], %6 {strides = array<i32>} : memref<16x122xf32, #tpu.memory_space<vmem>>, vector<16x11xf32>,
    %cst_8 = arith.constant 0.000000e+00 : f32
    %8 = vector.broadcast %cst_8 : f32 to vector<16x11xf32>
    %c0_9 = arith.constant 0 : index
    %c111 = arith.constant 111 : index
    %9 = vector.load %arg14[%c0_9, %c111] : memref<16x122xf32, #tpu.memory_space<vmem>>, vector<16x11xf32>
    tpu.vector_store %arg14[%c0_9, %c111], %8 {strides = array<i32>} : memref<16x122xf32, #tpu.memory_space<vmem>>, vector<16x11xf32>,
    %cst_10 = arith.constant 0.000000e+00 : f32
    %10 = vector.broadcast %cst_10 : f32 to vector<32x11xf32>
    %c0_11 = arith.constant 0 : index
    %c100 = arith.constant 100 : index
    %11 = vector.load %arg16[%c0_11, %c100] : memref<32x111xf32, #tpu.memory_space<vmem>>, vector<32x11xf32>
    tpu.vector_store %arg16[%c0_11, %c100], %10 {strides = array<i32>} : memref<32x111xf32, #tpu.memory_space<vmem>>, vector<32x11xf32>,
    %c0_12 = arith.constant 0 : index
    %c0_13 = arith.constant 0 : index
    %c0_14 = arith.constant 0 : index
    %12 = vector.load %arg1[%c0_12, %c0_13, %c0_14] : memref<1x3x324xf32, #tpu.memory_space<vmem>>, vector<1x3x324xf32>
    %13 = vector.shape_cast %12 : vector<1x3x324xf32> to vector<3x324xf32>
    %c0_15 = arith.constant 0 : index
    %c19 = arith.constant 19 : index
    %14 = vector.load %arg11[%c0_15, %c19] : memref<3x362xf32, #tpu.memory_space<vmem>>, vector<3x324xf32>
    tpu.vector_store %arg11[%c0_15, %c19], %13 {strides = array<i32>} : memref<3x362xf32, #tpu.memory_space<vmem>>, vector<3x324xf32>,
    %c0_16 = arith.constant 0 : index
    %c0_17 = arith.constant 0 : index
    %15 = vector.load %arg11[%c0_16, %c0_17] : memref<3x362xf32, #tpu.memory_space<vmem>>, vector<3x324xf32>
    %c0_18 = arith.constant 0 : index
    %c0_19 = arith.constant 0 : index
    %16 = vector.load %arg12[%c0_18, %c0_19] : memref<27x324xf32, #tpu.memory_space<vmem>>, vector<3x324xf32>
    tpu.vector_store %arg12[%c0_18, %c0_19], %15 {strides = array<i32>} : memref<27x324xf32, #tpu.memory_space<vmem>>, vector<3x324xf32>,
    %c0_20 = arith.constant 0 : index
    %c1 = arith.constant 1 : index
    %17 = vector.load %arg11[%c0_20, %c1] : memref<3x362xf32, #tpu.memory_space<vmem>>, vector<3x324xf32>
    %c3 = arith.constant 3 : index
    %c0_21 = arith.constant 0 : index
    %18 = vector.load %arg12[%c3, %c0_21] : memref<27x324xf32, #tpu.memory_space<vmem>>, vector<3x324xf32>
    tpu.vector_store %arg12[%c3, %c0_21], %17 {strides = array<i32>} : memref<27x324xf32, #tpu.memory_space<vmem>>, vector<3x324xf32>,
    %c0_22 = arith.constant 0 : index
    %c2 = arith.constant 2 : index
    %19 = vector.load %arg11[%c0_22, %c2] : memref<3x362xf32, #tpu.memory_space<vmem>>, vector<3x324xf32>
    %c6 = arith.constant 6 : index
    %c0_23 = arith.constant 0 : index
    %20 = vector.load %arg12[%c6, %c0_23] : memref<27x324xf32, #tpu.memory_space<vmem>>, vector<3x324xf32>
    tpu.vector_store %arg12[%c6, %c0_23], %19 {strides = array<i32>} : memref<27x324xf32, #tpu.memory_space<vmem>>, vector<3x324xf32>,
    %c0_24 = arith.constant 0 : index
    %c18 = arith.constant 18 : index
    %21 = vector.load %arg11[%c0_24, %c18] : memref<3x362xf32, #tpu.memory_space<vmem>>, vector<3x324xf32>
    %c9 = arith.constant 9 : index
    %c0_25 = arith.constant 0 : index
    %22 = vector.load %arg12[%c9, %c0_25] : memref<27x324xf32, #tpu.memory_space<vmem>>, vector<3x324xf32>
    tpu.vector_store %arg12[%c9, %c0_25], %21 {strides = array<i32>} : memref<27x324xf32, #tpu.memory_space<vmem>>, vector<3x324xf32>,
    %c0_26 = arith.constant 0 : index
    %c19_27 = arith.constant 19 : index
    %23 = vector.load %arg11[%c0_26, %c19_27] : memref<3x362xf32, #tpu.memory_space<vmem>>, vector<3x324xf32>
    %c12 = arith.constant 12 : index
    %c0_28 = arith.constant 0 : index
    %24 = vector.load %arg12[%c12, %c0_28] : memref<27x324xf32, #tpu.memory_space<vmem>>, vector<3x324xf32>
    tpu.vector_store %arg12[%c12, %c0_28], %23 {strides = array<i32>} : memref<27x324xf32, #tpu.memory_space<vmem>>, vector<3x324xf32>,
    %c0_29 = arith.constant 0 : index
    %c20 = arith.constant 20 : index
    %25 = vector.load %arg11[%c0_29, %c20] : memref<3x362xf32, #tpu.memory_space<vmem>>, vector<3x324xf32>
    %c15 = arith.constant 15 : index
    %c0_30 = arith.constant 0 : index
    %26 = vector.load %arg12[%c15, %c0_30] : memref<27x324xf32, #tpu.memory_space<vmem>>, vector<3x324xf32>
    tpu.vector_store %arg12[%c15, %c0_30], %25 {strides = array<i32>} : memref<27x324xf32, #tpu.memory_space<vmem>>, vector<3x324xf32>,
    %c0_31 = arith.constant 0 : index
    %c36 = arith.constant 36 : index
    %27 = vector.load %arg11[%c0_31, %c36] : memref<3x362xf32, #tpu.memory_space<vmem>>, vector<3x324xf32>
    %c18_32 = arith.constant 18 : index
    %c0_33 = arith.constant 0 : index
    %28 = vector.load %arg12[%c18_32, %c0_33] : memref<27x324xf32, #tpu.memory_space<vmem>>, vector<3x324xf32>
    tpu.vector_store %arg12[%c18_32, %c0_33], %27 {strides = array<i32>} : memref<27x324xf32, #tpu.memory_space<vmem>>, vector<3x324xf32>,
    %c0_34 = arith.constant 0 : index
    %c37 = arith.constant 37 : index
    %29 = vector.load %arg11[%c0_34, %c37] : memref<3x362xf32, #tpu.memory_space<vmem>>, vector<3x324xf32>
    %c21 = arith.constant 21 : index
    %c0_35 = arith.constant 0 : index
    %30 = vector.load %arg12[%c21, %c0_35] : memref<27x324xf32, #tpu.memory_space<vmem>>, vector<3x324xf32>
    tpu.vector_store %arg12[%c21, %c0_35], %29 {strides = array<i32>} : memref<27x324xf32, #tpu.memory_space<vmem>>, vector<3x324xf32>,
    %c0_36 = arith.constant 0 : index
    %c38 = arith.constant 38 : index
    %31 = vector.load %arg11[%c0_36, %c38] : memref<3x362xf32, #tpu.memory_space<vmem>>, vector<3x324xf32>
    %c24 = arith.constant 24 : index
    %c0_37 = arith.constant 0 : index
    %32 = vector.load %arg12[%c24, %c0_37] : memref<27x324xf32, #tpu.memory_space<vmem>>, vector<3x324xf32>
    tpu.vector_store %arg12[%c24, %c0_37], %31 {strides = array<i32>} : memref<27x324xf32, #tpu.memory_space<vmem>>, vector<3x324xf32>,
    %c0_38 = arith.constant 0 : index
    %c0_39 = arith.constant 0 : index
    %33 = vector.load %arg2[%c0_38, %c0_39] : memref<16x27xf32, #tpu.memory_space<vmem>>, vector<16x27xf32>
    %c0_40 = arith.constant 0 : index
    %c0_41 = arith.constant 0 : index
    %34 = vector.load %arg12[%c0_40, %c0_41] : memref<27x324xf32, #tpu.memory_space<vmem>>, vector<27x324xf32>
    %cst_42 = arith.constant dense<0.000000e+00> : vector<16x324xf32>
    %35 = tpu.matmul %33, %34, %cst_42 {dimension_numbers = #tpu.dot_dimension_numbers<[1], [0], [0], [1], [0, 0, 1, 1], [], []>} : vector<16x27xf32>, vector<27x324xf32>, vector<16x324xf32> -> vector<16x324xf32>
    %c0_43 = arith.constant 0 : index
    %c0_44 = arith.constant 0 : index
    %36 = vector.load %arg3[%c0_43, %c0_44] : memref<16x1xf32, #tpu.memory_space<vmem>>, vector<16x1xf32>
    %37 = vector.broadcast %36 : vector<16x1xf32> to vector<16x324xf32>
    %38 = arith.addf %35, %37 : vector<16x324xf32>
    %cst_45 = arith.constant 0.000000e+00 : f32
    %39 = vector.broadcast %cst_45 : f32 to vector<16x324xf32>
    %40 = arith.maximumf %38, %39 : vector<16x324xf32>
    %c0_46 = arith.constant 0 : index
    %c0_47 = arith.constant 0 : index
    %41 = vector.load %arg13[%c0_46, %c0_47] : memref<16x343xf32, #tpu.memory_space<vmem>>, vector<16x324xf32>
    tpu.vector_store %arg13[%c0_46, %c0_47], %40 {strides = array<i32>} : memref<16x343xf32, #tpu.memory_space<vmem>>, vector<16x324xf32>,
    %c0_48 = arith.constant 0 : index
    %c0_49 = arith.constant 0 : index
    %42 = vector.load %arg13[%c0_48, %c0_49] : memref<16x343xf32, #tpu.memory_space<vmem>>, vector<16x324xf32>
    %c0_50 = arith.constant 0 : index
    %c1_51 = arith.constant 1 : index
    %43 = vector.load %arg13[%c0_50, %c1_51] : memref<16x343xf32, #tpu.memory_space<vmem>>, vector<16x324xf32>
    %44 = arith.maximumf %42, %43 : vector<16x324xf32>
    %c0_52 = arith.constant 0 : index
    %c18_53 = arith.constant 18 : index
    %45 = vector.load %arg13[%c0_52, %c18_53] : memref<16x343xf32, #tpu.memory_space<vmem>>, vector<16x324xf32>
    %c0_54 = arith.constant 0 : index
    %c19_55 = arith.constant 19 : index
    %46 = vector.load %arg13[%c0_54, %c19_55] : memref<16x343xf32, #tpu.memory_space<vmem>>, vector<16x324xf32>
    %47 = arith.maximumf %45, %46 : vector<16x324xf32>
    %48 = arith.maximumf %44, %47 : vector<16x324xf32>
    %c0_56 = arith.constant 0 : index
    %c0_57 = arith.constant 0 : index
    %49 = vector.load %arg8[%c0_56, %c0_57] : memref<324x100xf32, #tpu.memory_space<vmem>>, vector<324x100xf32>
    %cst_58 = arith.constant dense<0.000000e+00> : vector<16x100xf32>
    %50 = tpu.matmul %48, %49, %cst_58 {dimension_numbers = #tpu.dot_dimension_numbers<[1], [0], [0], [1], [0, 0, 1, 1], [], []>} : vector<16x324xf32>, vector<324x100xf32>, vector<16x100xf32> -> vector<16x100xf32>
    %c0_59 = arith.constant 0 : index
    %c11 = arith.constant 11 : index
    %51 = vector.load %arg14[%c0_59, %c11] : memref<16x122xf32, #tpu.memory_space<vmem>>, vector<16x100xf32>
    tpu.vector_store %arg14[%c0_59, %c11], %50 {strides = array<i32>} : memref<16x122xf32, #tpu.memory_space<vmem>>, vector<16x100xf32>,
    %c0_60 = arith.constant 0 : index
    %c0_61 = arith.constant 0 : index
    %52 = vector.load %arg14[%c0_60, %c0_61] : memref<16x122xf32, #tpu.memory_space<vmem>>, vector<16x100xf32>
    %c0_62 = arith.constant 0 : index
    %c0_63 = arith.constant 0 : index
    %53 = vector.load %arg15[%c0_62, %c0_63] : memref<144x100xf32, #tpu.memory_space<vmem>>, vector<16x100xf32>
    tpu.vector_store %arg15[%c0_62, %c0_63], %52 {strides = array<i32>} : memref<144x100xf32, #tpu.memory_space<vmem>>, vector<16x100xf32>,
    %c0_64 = arith.constant 0 : index
    %c1_65 = arith.constant 1 : index
    %54 = vector.load %arg14[%c0_64, %c1_65] : memref<16x122xf32, #tpu.memory_space<vmem>>, vector<16x100xf32>
    %c16 = arith.constant 16 : index
    %c0_66 = arith.constant 0 : index
    %55 = vector.load %arg15[%c16, %c0_66] : memref<144x100xf32, #tpu.memory_space<vmem>>, vector<16x100xf32>
    tpu.vector_store %arg15[%c16, %c0_66], %54 {strides = array<i32>} : memref<144x100xf32, #tpu.memory_space<vmem>>, vector<16x100xf32>,
    %c0_67 = arith.constant 0 : index
    %c2_68 = arith.constant 2 : index
    %56 = vector.load %arg14[%c0_67, %c2_68] : memref<16x122xf32, #tpu.memory_space<vmem>>, vector<16x100xf32>
    %c32 = arith.constant 32 : index
    %c0_69 = arith.constant 0 : index
    %57 = vector.load %arg15[%c32, %c0_69] : memref<144x100xf32, #tpu.memory_space<vmem>>, vector<16x100xf32>
    tpu.vector_store %arg15[%c32, %c0_69], %56 {strides = array<i32>} : memref<144x100xf32, #tpu.memory_space<vmem>>, vector<16x100xf32>,
    %c0_70 = arith.constant 0 : index
    %c10 = arith.constant 10 : index
    %58 = vector.load %arg14[%c0_70, %c10] : memref<16x122xf32, #tpu.memory_space<vmem>>, vector<16x100xf32>
    %c48 = arith.constant 48 : index
    %c0_71 = arith.constant 0 : index
    %59 = vector.load %arg15[%c48, %c0_71] : memref<144x100xf32, #tpu.memory_space<vmem>>, vector<16x100xf32>
    tpu.vector_store %arg15[%c48, %c0_71], %58 {strides = array<i32>} : memref<144x100xf32, #tpu.memory_space<vmem>>, vector<16x100xf32>,
    %c0_72 = arith.constant 0 : index
    %c11_73 = arith.constant 11 : index
    %60 = vector.load %arg14[%c0_72, %c11_73] : memref<16x122xf32, #tpu.memory_space<vmem>>, vector<16x100xf32>
    %c64 = arith.constant 64 : index
    %c0_74 = arith.constant 0 : index
    %61 = vector.load %arg15[%c64, %c0_74] : memref<144x100xf32, #tpu.memory_space<vmem>>, vector<16x100xf32>
    tpu.vector_store %arg15[%c64, %c0_74], %60 {strides = array<i32>} : memref<144x100xf32, #tpu.memory_space<vmem>>, vector<16x100xf32>,
    %c0_75 = arith.constant 0 : index
    %c12_76 = arith.constant 12 : index
    %62 = vector.load %arg14[%c0_75, %c12_76] : memref<16x122xf32, #tpu.memory_space<vmem>>, vector<16x100xf32>
    %c80 = arith.constant 80 : index
    %c0_77 = arith.constant 0 : index
    %63 = vector.load %arg15[%c80, %c0_77] : memref<144x100xf32, #tpu.memory_space<vmem>>, vector<16x100xf32>
    tpu.vector_store %arg15[%c80, %c0_77], %62 {strides = array<i32>} : memref<144x100xf32, #tpu.memory_space<vmem>>, vector<16x100xf32>,
    %c0_78 = arith.constant 0 : index
    %c20_79 = arith.constant 20 : index
    %64 = vector.load %arg14[%c0_78, %c20_79] : memref<16x122xf32, #tpu.memory_space<vmem>>, vector<16x100xf32>
    %c96 = arith.constant 96 : index
    %c0_80 = arith.constant 0 : index
    %65 = vector.load %arg15[%c96, %c0_80] : memref<144x100xf32, #tpu.memory_space<vmem>>, vector<16x100xf32>
    tpu.vector_store %arg15[%c96, %c0_80], %64 {strides = array<i32>} : memref<144x100xf32, #tpu.memory_space<vmem>>, vector<16x100xf32>,
    %c0_81 = arith.constant 0 : index
    %c21_82 = arith.constant 21 : index
    %66 = vector.load %arg14[%c0_81, %c21_82] : memref<16x122xf32, #tpu.memory_space<vmem>>, vector<16x100xf32>
    %c112 = arith.constant 112 : index
    %c0_83 = arith.constant 0 : index
    %67 = vector.load %arg15[%c112, %c0_83] : memref<144x100xf32, #tpu.memory_space<vmem>>, vector<16x100xf32>
    tpu.vector_store %arg15[%c112, %c0_83], %66 {strides = array<i32>} : memref<144x100xf32, #tpu.memory_space<vmem>>, vector<16x100xf32>,
    %c0_84 = arith.constant 0 : index
    %c22 = arith.constant 22 : index
    %68 = vector.load %arg14[%c0_84, %c22] : memref<16x122xf32, #tpu.memory_space<vmem>>, vector<16x100xf32>
    %c128 = arith.constant 128 : index
    %c0_85 = arith.constant 0 : index
    %69 = vector.load %arg15[%c128, %c0_85] : memref<144x100xf32, #tpu.memory_space<vmem>>, vector<16x100xf32>
    tpu.vector_store %arg15[%c128, %c0_85], %68 {strides = array<i32>} : memref<144x100xf32, #tpu.memory_space<vmem>>, vector<16x100xf32>,
    %c0_86 = arith.constant 0 : index
    %c0_87 = arith.constant 0 : index
    %70 = vector.load %arg4[%c0_86, %c0_87] : memref<32x144xf32, #tpu.memory_space<vmem>>, vector<32x144xf32>
    %c0_88 = arith.constant 0 : index
    %c0_89 = arith.constant 0 : index
    %71 = vector.load %arg15[%c0_88, %c0_89] : memref<144x100xf32, #tpu.memory_space<vmem>>, vector<144x100xf32>
    %cst_90 = arith.constant dense<0.000000e+00> : vector<32x100xf32>
    %72 = tpu.matmul %70, %71, %cst_90 {dimension_numbers = #tpu.dot_dimension_numbers<[1], [0], [0], [1], [0, 0, 1, 1], [], []>} : vector<32x144xf32>, vector<144x100xf32>, vector<32x100xf32> -> vector<32x100xf32>
    %c0_91 = arith.constant 0 : index
    %c0_92 = arith.constant 0 : index
    %73 = vector.load %arg5[%c0_91, %c0_92] : memref<32x1xf32, #tpu.memory_space<vmem>>, vector<32x1xf32>
    %74 = vector.broadcast %73 : vector<32x1xf32> to vector<32x100xf32>
    %75 = arith.addf %72, %74 : vector<32x100xf32>
    %cst_93 = arith.constant 0.000000e+00 : f32
    %76 = vector.broadcast %cst_93 : f32 to vector<32x100xf32>
    %77 = arith.maximumf %75, %76 : vector<32x100xf32>
    %c0_94 = arith.constant 0 : index
    %c0_95 = arith.constant 0 : index
    %78 = vector.load %arg16[%c0_94, %c0_95] : memref<32x111xf32, #tpu.memory_space<vmem>>, vector<32x100xf32>
    tpu.vector_store %arg16[%c0_94, %c0_95], %77 {strides = array<i32>} : memref<32x111xf32, #tpu.memory_space<vmem>>, vector<32x100xf32>,
    %c0_96 = arith.constant 0 : index
    %c0_97 = arith.constant 0 : index
    %79 = vector.load %arg16[%c0_96, %c0_97] : memref<32x111xf32, #tpu.memory_space<vmem>>, vector<32x100xf32>
    %c0_98 = arith.constant 0 : index
    %c1_99 = arith.constant 1 : index
    %80 = vector.load %arg16[%c0_98, %c1_99] : memref<32x111xf32, #tpu.memory_space<vmem>>, vector<32x100xf32>
    %81 = arith.maximumf %79, %80 : vector<32x100xf32>
    %c0_100 = arith.constant 0 : index
    %c10_101 = arith.constant 10 : index
    %82 = vector.load %arg16[%c0_100, %c10_101] : memref<32x111xf32, #tpu.memory_space<vmem>>, vector<32x100xf32>
    %c0_102 = arith.constant 0 : index
    %c11_103 = arith.constant 11 : index
    %83 = vector.load %arg16[%c0_102, %c11_103] : memref<32x111xf32, #tpu.memory_space<vmem>>, vector<32x100xf32>
    %84 = arith.maximumf %82, %83 : vector<32x100xf32>
    %85 = arith.maximumf %81, %84 : vector<32x100xf32>
    %c0_104 = arith.constant 0 : index
    %c0_105 = arith.constant 0 : index
    %86 = vector.load %arg9[%c0_104, %c0_105] : memref<100x16xf32, #tpu.memory_space<vmem>>, vector<100x16xf32>
    %cst_106 = arith.constant dense<0.000000e+00> : vector<32x16xf32>
    %87 = tpu.matmul %85, %86, %cst_106 {dimension_numbers = #tpu.dot_dimension_numbers<[1], [0], [0], [1], [0, 0, 1, 1], [], []>} : vector<32x100xf32>, vector<100x16xf32>, vector<32x16xf32> -> vector<32x16xf32>
    %c0_107 = arith.constant 0 : index
    %c0_108 = arith.constant 0 : index
    %88 = vector.load %arg6[%c0_107, %c0_108] : memref<6x32xf32, #tpu.memory_space<vmem>>, vector<6x32xf32>
    %cst_109 = arith.constant dense<0.000000e+00> : vector<6x16xf32>
    %89 = tpu.matmul %88, %87, %cst_109 {dimension_numbers = #tpu.dot_dimension_numbers<[1], [0], [0], [1], [0, 0, 1, 1], [], []>} : vector<6x32xf32>, vector<32x16xf32>, vector<6x16xf32> -> vector<6x16xf32>
    %c0_110 = arith.constant 0 : index
    %c0_111 = arith.constant 0 : index
    %90 = vector.load %arg7[%c0_110, %c0_111] : memref<6x1xf32, #tpu.memory_space<vmem>>, vector<6x1xf32>
    %91 = vector.broadcast %90 : vector<6x1xf32> to vector<6x16xf32>
    %92 = arith.addf %89, %91 : vector<6x16xf32>
    %c0_112 = arith.constant 0 : index
    %c0_113 = arith.constant 0 : index
    %c0_114 = arith.constant 0 : index
    %93 = vector.load %arg10[%c0_112, %c0_113, %c0_114] : memref<1x6x16xf32, #tpu.memory_space<vmem>>, vector<1x6x16xf32>
    %94 = vector.shape_cast %93 : vector<1x6x16xf32> to vector<6x16xf32>
    %95 = vector.shape_cast %92 : vector<6x16xf32> to vector<1x6x16xf32>
    tpu.vector_store %arg10[%c0_112, %c0_113, %c0_114], %95 {strides = array<i32>} : memref<1x6x16xf32, #tpu.memory_space<vmem>>, vector<1x6x16xf32>,
    return
  }
  func.func @transform_0(%arg0: i32) -> (i32, i32, i32) {
    %c0_i32 = arith.constant 0 : i32
    %c0_i32_0 = arith.constant 0 : i32
    %c0_i32_1 = arith.constant 0 : i32
    return %arg0, %c0_i32, %c0_i32_0 : i32, i32, i32
  }
  func.func @transform_1(%arg0: i32) -> (i32, i32) {
    %c0_i32 = arith.constant 0 : i32
    %c0_i32_0 = arith.constant 0 : i32
    %c0_i32_1 = arith.constant 0 : i32
    return %c0_i32, %c0_i32_0 : i32, i32
  }
  func.func @transform_2(%arg0: i32) -> (i32, i32) {
    %c0_i32 = arith.constant 0 : i32
    %c0_i32_0 = arith.constant 0 : i32
    %c0_i32_1 = arith.constant 0 : i32
    return %c0_i32, %c0_i32_0 : i32, i32
  }
  func.func @transform_3(%arg0: i32) -> (i32, i32) {
    %c0_i32 = arith.constant 0 : i32
    %c0_i32_0 = arith.constant 0 : i32
    %c0_i32_1 = arith.constant 0 : i32
    return %c0_i32, %c0_i32_0 : i32, i32
  }
  func.func @transform_4(%arg0: i32) -> (i32, i32) {
    %c0_i32 = arith.constant 0 : i32
    %c0_i32_0 = arith.constant 0 : i32
    %c0_i32_1 = arith.constant 0 : i32
    return %c0_i32, %c0_i32_0 : i32, i32
  }
  func.func @transform_5(%arg0: i32) -> (i32, i32) {
    %c0_i32 = arith.constant 0 : i32
    %c0_i32_0 = arith.constant 0 : i32
    %c0_i32_1 = arith.constant 0 : i32
    return %c0_i32, %c0_i32_0 : i32, i32
  }
  func.func @transform_6(%arg0: i32) -> (i32, i32) {
    %c0_i32 = arith.constant 0 : i32
    %c0_i32_0 = arith.constant 0 : i32
    %c0_i32_1 = arith.constant 0 : i32
    return %c0_i32, %c0_i32_0 : i32, i32
  }
  func.func @transform_7(%arg0: i32) -> (i32, i32) {
    %c0_i32 = arith.constant 0 : i32
    %c0_i32_0 = arith.constant 0 : i32
    %c0_i32_1 = arith.constant 0 : i32
    return %c0_i32, %c0_i32_0 : i32, i32
  }
  func.func @transform_8(%arg0: i32) -> (i32, i32) {
    %c0_i32 = arith.constant 0 : i32
    %c0_i32_0 = arith.constant 0 : i32
    %c0_i32_1 = arith.constant 0 : i32
    return %c0_i32, %c0_i32_0 : i32, i32
  }
  func.func @transform_9(%arg0: i32) -> (i32, i32, i32) {
    %c0_i32 = arith.constant 0 : i32
    %c0_i32_0 = arith.constant 0 : i32
    %c0_i32_1 = arith.constant 0 : i32
    return %arg0, %c0_i32, %c0_i32_0 : i32, i32, i32
  }
}

</mosaic_0001>

<bundles_post_ra>
// kernel: tpu_custom_call.1
= control target key start
LH: loop header
LB: loop body
LE: loop exit
PB: predicated region body
PF: predicated region fallthrough
CT: control target
= control target key end

     0   :  { %s1535_s30 = smov 0   ;;  %s1924_s0 = inlined_call_operand.vmem [shape: f32[2,3,324], index: 0, kind: input, shape index: {}]   ;;  %s1925_s1 = inlined_call_operand.vmem [shape: f32[16,27], index: 1, kind: input, shape index: {}]   ;;  %s1926_s2 = inlined_call_operand.vmem [shape: f32[16,1], index: 2, kind: input, shape index: {}]   ;;  %s1927_s3 = inlined_call_operand.vmem [shape: f32[32,144], index: 3, kind: input, shape index: {}]   ;;  %s1928_s4 = inlined_call_operand.vmem [shape: f32[32,1], index: 4, kind: input, shape index: {}]   ;;  %s1929_s5 = inlined_call_operand.vmem [shape: f32[6,32], index: 5, kind: input, shape index: {}]   ;;  %s1930_s6 = inlined_call_operand.vmem [shape: f32[6,1], index: 6, kind: input, shape index: {}]   ;;  %s1931_s7 = inlined_call_operand.vmem [shape: f32[324,100], index: 7, kind: input, shape index: {}]   ;;  %s1932_s8 = inlined_call_operand.vmem [shape: f32[100,16], index: 8, kind: input, shape index: {}]   ;;  %s1933_s9 = inlined_call_operand.vmem [shape: f32[2,6,16], index: 9, kind: output, shape index: {}]  }
   0x1 LB: > { %s1367_s10 = sadd.s32 4294967295, %s1466_s30   ;;  %p1371_p0 = scmp.ge.s32.totalorder %s1466_s30, 1  ;;  %s1466_s30 = sphi %s1535_s30, %s19_s30  }
   0x2   : > { %p287_p1 = scmp.lt.s32.totalorder %s1466_s30, 3 }
   0x4   : > { %p288_p2 = pnand %p1371_p0, %p287_p1 }
   0x5   : > { %p322_p3 = scmp.lt.s32.totalorder (!%p288_p2), %s1367_s10, 1  ;;  %s1469_s15 = smov (!%p288_p2), 19  }
   0x6   : > { %291 = sbr.rel (%p288_p2) target bundleno = 1831 (0x727), region = 56  ;;  %s1470_s16 = smov (!%p288_p2), 127  }
   0x7   : > { %s1471_s17 = smov (!%p288_p2), 126   ;;  %s1472_s18 = smov (!%p288_p2), 110  }
   0x8   : > { %s1473_s19 = smov (!%p288_p2), 109   ;;  %s1474_s20 = smov (!%p288_p2), 108  }
   0x9   : > { %s1475_s21 = smov (!%p288_p2), 92   ;;  %s1476_s22 = smov (!%p288_p2), 91  }
   0xa   : > { %s1477_s23 = smov (!%p288_p2), 90   ;;  %s1483_s24 = smov (!%p288_p2), 118  }
   0xb   : > { %vm331_vm0 = vcmask 149504   ;;  %v1468_v0 = vmov 0.0   ;;  %s1935_s10 = smov (!%p322_p3, %s1367_s10), 1  ;;  %vm333_vm1 = vcmask 862904   ;;  %vm363_vm2 = vcmask 1042584  }
   0xc   : > { %332 = vst.msk [vmem:[#allocation2] sm:$0x7] %vm331_vm0, %v1468_v0  ;;  %s1411_s11 = smul.u32 12, %s1935_s10  ;;  %vm364_vm3 = vcmask 1046532   ;;  %vm358_vm4 = vcmask 154624   ;;  %vm367_vm6 = vcmask 706560  }
   0xd   : > { %334 = vst.msk [vmem:[#allocation2 + $0x8] sm:$0x7] %vm333_vm1, %v1468_v0  ;;  %vm365_vm5 = vmor %vm364_vm3, %vm363_vm2  ;;  %vm384_vm7 = vcmask 550912   ;;  %vm413_vm8 = vcmask 553987   ;;  %vm502_vm9 = vcmask 555012   ;;  %vm434_vm10 = vcmask 1031168  }
   0xe   : > { %s326_s14 = scalar_lea.vmem %s1924_s0, %s1411_s11  ;;  %vm442_vm11 = vcmask 556038   ;;  %vm446_vm12 = vcmask 548864   ;;  %vm475_vm13 = vcmask 551937   ;;  %vm564_vm14 = vcmask 552962   ;;  %s1373_s25 = sshll.u32 %s1935_s10, 3 }
   0xf   : > { %v349_v1 = vld [vmem:[%s326_s14] sm:$0x77]  ;;  %v350_v2 = vld [vmem:[%s326_s14 + $0x8] sm:$0x7]  ;;  %vm467_vm15 = vcmask 900096   ;;  %vm531_vm0 = vcmask 556039   ;;  %s330_s27 = scalar_lea.vmem %s1933_s9, %s1373_s25 }
  0x10   : > { %353 = vrot.lane.b32.xlu0 %v349_v1, %s1469_s15  ;;  %vm535_vm1 = vcmask 549888   ;;  %vm593_vm2 = vcmask 556037   ;;  %vm523_vm3 = vcmask 883712  }
  0x18   : > { %355 = vrot.lane.b32.xlu0 %v350_v2, %s1469_s15 }
  0x82   : > { %v354_v3 = vpop.permute.xlu0 %353 }
  0x83   : > { %v357_v4 = vrot.slane %v354_v3, 4 }
  0x85   : > { %v359_v5 = vsel %vm358_vm4, %v357_v4, %v354_v3 }
  0x86   : > { %366 = vst.msk [vmem:[#allocation2] sm:$0x77] %vm365_vm5, %v359_v5  ;;  %vm585_vm5 = vcmask 744448  }
  0x8a   : > { %v356_v6 = vpop.permute.xlu0 %355 }
  0x8b   : > { %v360_v7 = vsel %vm358_vm4, %v357_v4, %v356_v6  ;;  %vm556_vm4 = vcmask 752640  }
  0x8c   : > { %368 = vst.msk [vmem:[#allocation2 + $0x8] sm:$0x7] %vm367_vm6, %v360_v7  ;;  %vm494_vm6 = vcmask 891904  }
  0x8d   : > { %v369_v8 = vld [vmem:[#allocation2] sm:$0x77] }
  0x8e   : > { %373 = vst [vmem:[#allocation1] ss:$2 sm:$0xff] %v369_v8  ;;  %v386_v10 = vld [vmem:[#allocation2] sm:$0x77] }
  0x8f   : > { %v415_v15 = vld [vmem:[#allocation2] sm:$0x77] }
  0x90   : > { %v448_v20 = vld [vmem:[#allocation2] sm:$0x77] }
  0x91   : > { %v477_v27 = vld [vmem:[#allocation2] sm:$0x77] }
  0x92   : > { %v504_v34 = vld [vmem:[#allocation2] sm:$0x77] }
  0x93   : > { %v370_v9 = vld [vmem:[#allocation2 + $0x8] sm:$0x7]  ;;  %v537_v41 = vld [vmem:[#allocation2] sm:$0x77] }
  0x94   : > { %375 = vst [vmem:[#allocation1 + $0x10] ss:$2 sm:$0xff] %v370_v9  ;;  %v387_v13 = vld [vmem:[#allocation2 + $0x8] sm:$0x7]  ;;  %v566_v47 = vld [vmem:[#allocation2] sm:$0x77] }
  0x95   : > { %v376_v11 = vld.sshfl [vmem:[#allocation1] sm:$0xff pattern:$0x75316420]  ;;  %v377_v12 = vld.sshfl [vmem:[#allocation1 + $0x8] sm:$0xff pattern:$0x75316420] }
  0x96   : > { %390 = vst [vmem:[#allocation1] ss:$2 sm:$0xff] %v386_v10  ;;  %v416_v18 = vld [vmem:[#allocation2 + $0x8] sm:$0x7]  ;;  %v595_v52 = vld [vmem:[#allocation2] sm:$0x77] }
  0x97   : > { %382 = vst [vmem:[#allocation3] sm:$0x7] %v376_v11  ;;  %v449_v26 = vld [vmem:[#allocation2 + $0x8] sm:$0x7] }
  0x98   : > { %383 = vst [vmem:[#allocation3 + $0x8] sm:$0x7] %v377_v12  ;;  %v478_v33 = vld [vmem:[#allocation2 + $0x8] sm:$0x7] }
  0x99   : > { %v505_v40 = vld [vmem:[#allocation2 + $0x8] sm:$0x7] }
  0x9a   : > { %v538_v45 = vld [vmem:[#allocation2 + $0x8] sm:$0x7] }
  0x9b   : > { %v378_v14 = vld.sshfl [vmem:[#allocation1 + $0x10] sm:$0xff pattern:$0x75316420] }
  0x9c   : > { %392 = vst [vmem:[#allocation1 + $0x10] ss:$2 sm:$0xff] %v387_v13  ;;  %v567_v53 = vld [vmem:[#allocation2 + $0x8] sm:$0x7] }
  0x9d   : > { %v1551_v16 = vld.sshfl [vmem:[#allocation1] sm:$0xff pattern:$0x75316420]  ;;  %v1553_v17 = vld.sshfl [vmem:[#allocation1 + $0x8] sm:$0xff pattern:$0x75316420] }
  0x9e   : > { %419 = vst [vmem:[#allocation1] ss:$2 sm:$0xff] %v415_v15  ;;  %v596_v60 = vld [vmem:[#allocation2 + $0x8] sm:$0x7]  ;;  %v396_v2 = vrot.slane %v1551_v16, 5  ;;  %v397_v7 = vrot.slane %v1553_v17, 5 }
  0x9f   : > { %385 = vst.msk [vmem:[#allocation3 + $0x10] sm:$0x7] %vm384_vm7, %v378_v14 }
  0xa3   : > { %v395_v19 = vld.sshfl [vmem:[#allocation1 + $0x10] sm:$0xff pattern:$0x75316420] }
  0xa4   : > { %v398_v21 = vrot.slane %v395_v19, 5  ;;  %421 = vst [vmem:[#allocation1 + $0x10] ss:$2 sm:$0xff] %v416_v18 }
  0xa5   : > { %v423_v22 = vld.sshfl [vmem:[#allocation1 + $0x8] sm:$0xff pattern:$0x75316420]  ;;  %v422_v23 = vld.sshfl [vmem:[#allocation1] sm:$0xff pattern:$0x75316420] }
  0xa6   : > { %403 = vrot.lane.b32.xlu2 %v398_v21, %s1470_s16  ;;  %v426_v24 = vrot.slane %v423_v22, 2  ;;  %452 = vst [vmem:[#allocation1] ss:$2 sm:$0xff] %v448_v20  ;;  %v425_v36 = vrot.slane %v422_v23, 2 }
  0xa8   : > { %430 = vrot.lane.b32.xlu1 %v426_v24, %s1471_s17 }
  0xab   : > { %v424_v25 = vld.sshfl [vmem:[#allocation1 + $0x10] sm:$0xff pattern:$0x75316420] }
  0xac   : > { %v427_v28 = vrot.slane %v424_v25, 2  ;;  %454 = vst [vmem:[#allocation1 + $0x10] ss:$2 sm:$0xff] %v449_v26 }
  0xad   : > { %v455_v29 = vld.sshfl [vmem:[#allocation1] sm:$0xff pattern:$0x75316420]  ;;  %v456_v30 = vld.sshfl [vmem:[#allocation1 + $0x8] sm:$0xff pattern:$0x75316420] }
  0xae   : > { %432 = vrot.lane.b32.xlu0 %v427_v28, %s1471_s17  ;;  %v458_v31 = vrot.slane %v455_v29, 7  ;;  %482 = vst [vmem:[#allocation1 + $0x1] ss:$2 sm:$0xff] %v477_v27  ;;  %v459_v42 = vrot.slane %v456_v30, 7 }
  0xb0   : > { %461 = vrot.lane.b32.xlu2 %v458_v31, %s1472_s18 }
  0xb3   : > { %v457_v32 = vld.sshfl [vmem:[#allocation1 + $0x10] sm:$0xff pattern:$0x75316420] }
  0xb4   : > { %v460_v35 = vrot.slane %v457_v32, 7  ;;  %484 = vst [vmem:[#allocation1 + $0x11] ss:$2 sm:$0xff] %v478_v33 }
  0xb5   : > { %v1560_v37 = vld.sshfl [vmem:[#allocation1 + $0x8] sm:$0xff pattern:$0x75316420]  ;;  %v485_v38 = vld.sshfl [vmem:[#allocation1] sm:$0xff pattern:$0x75316420] }
  0xb6   : > { %465 = vrot.lane.b32.xlu1 %v460_v35, %s1472_s18  ;;  %428 = vrot.lane.b32.xlu0 %v425_v36, %s1471_s17  ;;  %508 = vst [vmem:[#allocation1] ss:$2 sm:$0xff] %v504_v34 }
  0xbb   : > { %v487_v39 = vld.sshfl [vmem:[#allocation1 + $0x10] sm:$0xff pattern:$0x75316420] }
  0xbc   : > { %510 = vst [vmem:[#allocation1 + $0x10] ss:$2 sm:$0xff] %v505_v40  ;;  %492 = vrot.lane.b32.xlu2 %v487_v39, %s1473_s19  ;;  %v635_v40 = vld [vmem:[%s1926_s2 + $0x8] sm:$0xff] }
  0xbd   : > { %v511_v43 = vld.sshfl [vmem:[#allocation1] sm:$0xff pattern:$0x75316420]  ;;  %v512_v44 = vld.sshfl [vmem:[#allocation1 + $0x8] sm:$0xff pattern:$0x75316420] }
  0xbe   : > { %488 = vrot.lane.b32.xlu1 %v485_v38, %s1473_s19  ;;  %463 = vrot.lane.b32.xlu0 %v459_v42, %s1472_s18  ;;  %541 = vst [vmem:[#allocation1] ss:$2 sm:$0xff] %v537_v41  ;;  %v514_v49 = vrot.slane %v511_v43, 1  ;;  %v515_v55 = vrot.slane %v512_v44, 1  ;;  %v634_v41 = vld [vmem:[%s1926_s2] sm:$0xff]  ;;  %v1478_v42 = vmov 0  }
  0xbf   : > { %1438 = vset.pattern.permute.xlu0 %v1478_v42  ;;  %1437 = vset.pattern.permute.xlu2 %v1478_v42 }
  0xc0   : > { %1459 = vset.pattern.permute.xlu1 %v1478_v42 }
  0xc3   : > { %v513_v46 = vld.sshfl [vmem:[#allocation1 + $0x10] sm:$0xff pattern:$0x75316420] }
  0xc4   : > { %v516_v48 = vrot.slane %v513_v46, 1  ;;  %543 = vst [vmem:[#allocation1 + $0x10] ss:$2 sm:$0xff] %v538_v45 }
  0xc5   : > { %v544_v50 = vld.sshfl [vmem:[#allocation1] sm:$0xff pattern:$0x75316420]  ;;  %v545_v51 = vld.sshfl [vmem:[#allocation1 + $0x8] sm:$0xff pattern:$0x75316420] }
  0xc6   : > { %521 = vrot.lane.b32.xlu1 %v516_v48, %s1474_s20  ;;  %517 = vrot.lane.b32.xlu0 %v514_v49, %s1474_s20  ;;  %570 = vst [vmem:[#allocation1] ss:$2 sm:$0xff] %v566_v47  ;;  %v548_v56 = vrot.slane %v545_v51, 6  ;;  %v547_v1 = vrot.slane %v544_v50, 6  ;;  %v620_v50 = vld [vmem:[%s1925_s1] sm:$0xff] }
  0xcb   : > { %v546_v54 = vld.sshfl [vmem:[#allocation1 + $0x10] sm:$0xff pattern:$0x75316420] }
  0xcc   : > { %v549_v57 = vrot.slane %v546_v54, 6  ;;  %572 = vst [vmem:[#allocation1 + $0x10] ss:$2 sm:$0xff] %v567_v53 }
  0xcd   : > { %v574_v58 = vld.sshfl [vmem:[#allocation1 + $0x8] sm:$0xff pattern:$0x75316420]  ;;  %v573_v59 = vld.sshfl [vmem:[#allocation1] sm:$0xff pattern:$0x75316420] }
  0xce   : > { %519 = vrot.lane.b32.xlu1 %v515_v55, %s1474_s20  ;;  %552 = vrot.lane.b32.xlu0 %v548_v56, %s1475_s21  ;;  %599 = vst [vmem:[#allocation1] ss:$2 sm:$0xff] %v595_v52  ;;  %v576_v62 = vrot.slane %v573_v59, 3  ;;  %v577_v6 = vrot.slane %v574_v58, 3 }
  0xcf   : > { %554 = vrot.lane.b32.xlu2 %v549_v57, %s1475_s21 }
  0xd3   : > { %v575_v61 = vld.sshfl [vmem:[#allocation1 + $0x10] sm:$0xff pattern:$0x75316420] }
  0xd4   : > { %601 = vst [vmem:[#allocation1 + $0x10] ss:$2 sm:$0xff] %v596_v60  ;;  %v578_v4 = vrot.slane %v575_v61, 3  ;;  %v621_v61 = vld [vmem:[%s1925_s1 + $0x8] sm:$0xff] }
  0xd5   : > { %v602_v63 = vld.sshfl [vmem:[#allocation1] sm:$0xff pattern:$0x75316420]  ;;  %v603_v5 = vld.sshfl [vmem:[#allocation1 + $0x8] sm:$0xff pattern:$0x75316420] }
  0xd6   : > { %579 = vrot.lane.b32.xlu1 %v576_v62, %s1476_s22  ;;  %605 = vrot.lane.b32.xlu0 %v602_v63, %s1477_s23 }
  0xd7   : > { %550 = vrot.lane.b32.xlu2 %v547_v1, %s1475_s21  ;;  %s1480_s21 = smov 107  }
  0xdb   : > { %v604_v3 = vld.sshfl [vmem:[#allocation1 + $0x10] sm:$0xff pattern:$0x75316420] }
  0xde   : > { %609 = vrot.lane.b32.xlu1 %v604_v3, %s1477_s23  ;;  %399 = vrot.lane.b32.xlu0 %v396_v2, %s1470_s16 }
  0xdf   : > { %583 = vrot.lane.b32.xlu2 %v578_v4, %s1476_s22 }
  0xe6   : > { %607 = vrot.lane.b32.xlu1 %v603_v5, %s1477_s23  ;;  %643 = vperm.xlu0 %1438, %v635_v40   ;;  %s1482_s23 = smov 117  }
  0xe7   : > { %581 = vrot.lane.b32.xlu2 %v577_v6, %s1476_s22  ;;  %s1481_s22 = smov 116  }
  0xee   : > { %401 = vrot.lane.b32.xlu1 %v397_v7, %s1470_s16 }
  0xef   : > { %490 = vrot.lane.b32.xlu2 %v1560_v37, %s1473_s19  ;;  %s1479_s19 = smov 11  }
  0xf7   : > { %638 = vperm.xlu2 %1437, %v634_v41  }
 0x100   : > { %v1576_v8 = vpop.permute.xlu2 %403 }
 0x101   : > { %414 = vst.msk [vmem:[#allocation3 + $0x10] sm:$0x38] %vm413_vm8, %v1576_v8  ;;  %vm611_vm8 = vcmask 736256  }
 0x10a   : > { %v462_v9 = vpop.permute.xlu2 %461 }
 0x116   : > { %v1579_v10 = vpop.permute.xlu2 %492 }
 0x117   : > { %503 = vst.msk [vmem:[#allocation3 + $0x28] sm:$0x70] %vm502_vm9, %v1579_v10  ;;  %vm653_vm9 = vcmask 1042432  }
 0x11a   : > { %v431_v11 = vpop.permute.xlu1 %430 }
 0x120   : > { %v433_v12 = vpop.permute.xlu0 %432 }
 0x121   : > { %v436_v13 = vsel %vm434_vm10, %v431_v11, %v433_v12  ;;  %443 = vst.msk [vmem:[#allocation3 + $0x10] sm:$0xc0] %vm442_vm11, %v433_v12  ;;  %vm335_vm11 = vcmask 712224  }
 0x122   : > { %441 = vst [vmem:[#allocation3 + $0x8] sm:$0xc0] %v436_v13 }
 0x123   : > { %445 = vst [vmem:[#allocation3 + $0x20] sm:$0x1] %v436_v13 }
 0x124   : > { %447 = vst.msk [vmem:[#allocation3 + $0x28] sm:$0x1] %vm446_vm12, %v433_v12  ;;  %vm740_vm12 = vcmask 556032  }
 0x125   : > { %336 = vst.msk [vmem:[#allocation4 + $0x10] sm:$0xff] %vm335_vm11, %v1468_v0 }
 0x126   : > { %337 = vst.msk [vmem:[#allocation4 + $0x28] sm:$0xff] %vm335_vm11, %v1468_v0 }
 0x128   : > { %v466_v14 = vpop.permute.xlu1 %465  ;;  %v429_v15 = vpop.permute.xlu0 %428  ;;  %v624_v51 = vld [vmem:[#allocation3 + $0x10] sm:$0xff] }
 0x129   : > { %476 = vst.msk [vmem:[#allocation3 + $0x28] sm:$0xe] %vm475_vm13, %v466_v14  ;;  %v435_v16 = vsel %vm434_vm10, %v429_v15, %v431_v11  ;;  %v555_v17 = vpop.permute.xlu2 %554  ;;  %vm405_vm10 = vcmask 1039360   ;;  %vm866_vm13 = vcmask 1043456  }
 0x12a   : > { %440 = vst [vmem:[#allocation3] sm:$0xc0] %v435_v16 }
 0x12b   : > { %444 = vst [vmem:[#allocation3 + $0x18] sm:$0x1] %v435_v16 }
 0x12c   : > { %565 = vst.msk [vmem:[#allocation3 + $0x40] sm:$0x1c] %vm564_vm14, %v555_v17  ;;  %vm338_vm14 = vcmask 89088  }
 0x12d   : > { %339 = vst.msk [vmem:[#allocation5] sm:$0xff] %vm338_vm14, %v1468_v0 }
 0x12e   : > { %340 = vst.msk [vmem:[#allocation5 + $0x8] sm:$0xff] %vm338_vm14, %v1468_v0 }
 0x130   : > { %v489_v18 = vpop.permute.xlu1 %488  ;;  %v464_v19 = vpop.permute.xlu0 %463 }
 0x131   : > { %v468_v20 = vsel %vm467_vm15, %v462_v9, %v464_v19  ;;  %v469_v21 = vsel %vm467_vm15, %v464_v19, %v466_v14  ;;  %v551_v22 = vpop.permute.xlu2 %550 }
 0x132   : > { %473 = vst [vmem:[#allocation3 + $0x18] sm:$0xe] %v468_v20 }
 0x133   : > { %474 = vst [vmem:[#allocation3 + $0x20] sm:$0xe] %v469_v21 }
 0x138   : > { %v522_v23 = vpop.permute.xlu1 %521  ;;  %v518_v24 = vpop.permute.xlu0 %517 }
 0x139   : > { %532 = vst.msk [vmem:[#allocation3 + $0x28] sm:$0x80] %vm531_vm0, %v522_v23  ;;  %v584_v25 = vpop.permute.xlu2 %583  ;;  %vm341_vm0 = vcmask 999288  }
 0x13a   : > { %536 = vst.msk [vmem:[#allocation3 + $0x40] sm:$0x3] %vm535_vm1, %v522_v23  ;;  %vm952_vm1 = vcmask 818176  }
 0x13b   : > { %594 = vst.msk [vmem:[#allocation3 + $0x40] sm:$0xe0] %vm593_vm2, %v584_v25  ;;  %vm1101_vm2 = vcmask 130048  }
 0x13c   : > { %342 = vst.msk [vmem:[#allocation5] sm:$0xff] %vm341_vm0, %v1468_v0 }
 0x13d   : > { %343 = vst.msk [vmem:[#allocation5 + $0x8] sm:$0xff] %vm341_vm0, %v1468_v0 }
 0x140   : > { %v520_v26 = vpop.permute.xlu1 %519  ;;  %v553_v27 = vpop.permute.xlu0 %552  ;;  %v627_v49 = vld [vmem:[#allocation3 + $0x28] sm:$0xff] }
 0x141   : > { %v524_v28 = vsel %vm523_vm3, %v518_v24, %v520_v26  ;;  %v525_v29 = vsel %vm523_vm3, %v520_v26, %v522_v23  ;;  %v582_v30 = vpop.permute.xlu2 %581  ;;  %v557_v31 = vsel %vm556_vm4, %v551_v22, %v553_v27  ;;  %v558_v32 = vsel %vm556_vm4, %v553_v27, %v555_v17 }
 0x142   : > { %529 = vst [vmem:[#allocation3 + $0x18] sm:$0x80] %v524_v28  ;;  %v587_v33 = vsel %vm585_vm5, %v582_v30, %v584_v25  ;;  %v630_v48 = vld [vmem:[#allocation3 + $0x40] sm:$0xff]  ;;  %vm344_vm3 = vcmask 909088   ;;  %vm1288_vm4 = vcmask 261120  }
 0x143   : > { %530 = vst [vmem:[#allocation3 + $0x20] sm:$0x80] %v525_v29 }
 0x144   : > { %533 = vst [vmem:[#allocation3 + $0x30] sm:$0x3] %v524_v28  ;;  %v859_v28 = vld [vmem:[%s1931_s7 + $0x140] sm:$0xf] }
 0x145   : > { %534 = vst [vmem:[#allocation3 + $0x38] sm:$0x3] %v525_v29  ;;  %v858_v29 = vld [vmem:[%s1931_s7 + $0x138] sm:$0xff] }
 0x146   : > { %562 = vst [vmem:[#allocation3 + $0x30] sm:$0x1c] %v557_v31  ;;  %v856_v31 = vld [vmem:[%s1931_s7 + $0x128] sm:$0xff] }
 0x147   : > { %563 = vst [vmem:[#allocation3 + $0x38] sm:$0x1c] %v558_v32  ;;  %v855_v32 = vld [vmem:[%s1931_s7 + $0x120] sm:$0xff] }
 0x148   : > { %592 = vst [vmem:[#allocation3 + $0x38] sm:$0xe0] %v587_v33  ;;  %v580_v34 = vpop.permute.xlu1 %579  ;;  %v606_v43 = vpop.permute.xlu0 %605  ;;  %v854_v33 = vld [vmem:[%s1931_s7 + $0x118] sm:$0xff] }
 0x149   : > { %v586_v35 = vsel %vm585_vm5, %v580_v34, %v582_v30  ;;  %v491_v36 = vpop.permute.xlu2 %490  ;;  %v857_v30 = vld [vmem:[%s1931_s7 + $0x130] sm:$0xff]  ;;  %345 = vst.msk [vmem:[#allocation7] sm:$0xff] %vm344_vm3, %v1468_v0  ;;  %vm1312_vm5 = vcmask 128000  }
 0x14a   : > { %591 = vst [vmem:[#allocation3 + $0x30] sm:$0xe0] %v586_v35  ;;  %v495_v37 = vsel %vm494_vm6, %v489_v18, %v491_v36  ;;  %v496_v38 = vsel %vm494_vm6, %v491_v36, %v1579_v10  ;;  %v853_v34 = vld [vmem:[%s1931_s7 + $0x110] sm:$0xff]  ;;  %v852_v35 = vld [vmem:[%s1931_s7 + $0x108] sm:$0xff] }
 0x14b   : > { %500 = vst [vmem:[#allocation3 + $0x18] sm:$0x70] %v495_v37 }
 0x14c   : > { %501 = vst [vmem:[#allocation3 + $0x20] sm:$0x70] %v496_v38 }
 0x14d   : > { %346 = vst.msk [vmem:[#allocation7 + $0x8] sm:$0xff] %vm344_vm3, %v1468_v0 }
 0x14e   : > { %347 = vst.msk [vmem:[#allocation7 + $0x10] sm:$0xff] %vm344_vm3, %v1468_v0 }
 0x14f   : > { %v629_v59 = vld [vmem:[#allocation3 + $0x38] sm:$0xff]  ;;  %348 = vst.msk [vmem:[#allocation7 + $0x18] sm:$0xff] %vm344_vm3, %v1468_v0 }
 0x150   : > { %v610_v39 = vpop.permute.xlu1 %609  ;;  %v400_v52 = vpop.permute.xlu0 %399 }
 0x151   : > { %619 = vst.msk [vmem:[#allocation3 + $0x58] sm:$0x7] %vm384_vm7, %v610_v39  ;;  %vm646_vm7 = vcmask 220160   ;;  %v628_v58 = vld [vmem:[#allocation3 + $0x30] sm:$0xff]  ;;  %v639_v2 = vpop.permute.xlu2 %638 }
 0x152   : > { %v625_v60 = vld [vmem:[#allocation3 + $0x18] sm:$0xff] }
 0x153   : > { %v626_v62 = vld [vmem:[#allocation3 + $0x20] sm:$0xff] }
 0x158   : > { %v608_v44 = vpop.permute.xlu1 %607  ;;  %v633_v45 = vld [vmem:[#allocation3 + $0x58] sm:$0x7]  ;;  %v644_v9 = vpop.permute.xlu0 %643 }
 0x159   : > { %v612_v46 = vsel %vm611_vm8, %v606_v43, %v608_v44  ;;  %v613_v47 = vsel %vm611_vm8, %v608_v44, %v610_v39  ;;  %1380 = vmatpush.msk.msra.mxu2 %vm653_vm9, %v633_v45 }
 0x15a   : > { %617 = vst [vmem:[#allocation3 + $0x48] sm:$0x7] %v612_v46 }
 0x15b   : > { %618 = vst [vmem:[#allocation3 + $0x50] sm:$0x7] %v613_v47  ;;  %722 = vmatpush.msra.mxu2 %v630_v48 }
 0x15d   : > { %723 = vmatpush.msra.mxu2 %v627_v49 }
 0x15f   : > { %724 = vmatpush.msra.mxu2 %v624_v51 }
 0x160   : > { %v402_v53 = vpop.permute.xlu1 %401  ;;  %1381 = vmatmul.msk.f32.vlgmr.msra.gmra.mxu2 %vm646_vm7, %v620_v50 }
 0x161   : > { %v406_v54 = vsel %vm405_vm10, %v400_v52, %v402_v53  ;;  %v407_v55 = vsel %vm405_vm10, %v402_v53, %v1576_v8  ;;  %v631_v56 = vld [vmem:[#allocation3 + $0x48] sm:$0x7] }
 0x162   : > { %411 = vst [vmem:[#allocation3] sm:$0x38] %v406_v54  ;;  %1374 = vmatpush.msk.msra.mxu0 %vm653_vm9, %v631_v56  ;;  %v632_v57 = vld [vmem:[#allocation3 + $0x50] sm:$0x7]  ;;  %v850_v56 = vld [vmem:[%s1931_s7 + $0xf8] sm:$0xff] }
 0x163   : > { %412 = vst [vmem:[#allocation3 + $0x8] sm:$0x38] %v407_v55  ;;  %1377 = vmatpush.msk.msra.mxu1 %vm653_vm9, %v632_v57  ;;  %v851_v54 = vld [vmem:[%s1931_s7 + $0x100] sm:$0xff]  ;;  %v834_v55 = vld [vmem:[%s1931_s7 + $0x78] sm:$0xff]  ;;  %v833_v57 = vld [vmem:[%s1931_s7 + $0x70] sm:$0xff] }
 0x164   : > { %676 = vmatpush.msra.mxu0 %v628_v58  ;;  %870 = vmatpush.msra.mxu3 %v834_v55  ;;  %v849_v58 = vld [vmem:[%s1931_s7 + $0xf0] sm:$0xff] }
 0x165   : > { %699 = vmatpush.msra.mxu1 %v629_v59  ;;  %v832_v59 = vld [vmem:[%s1931_s7 + $0x68] sm:$0xff] }
 0x166   : > { %677 = vmatpush.msra.mxu0 %v625_v60  ;;  %v848_v60 = vld [vmem:[%s1931_s7 + $0xe8] sm:$0xff]  ;;  %871 = vmatpush.msra.mxu3 %v833_v57  ;;  %v1080_v57 = vld [vmem:[%s1928_s4 + $0x18] sm:$0xff] }
 0x167   : > { %700 = vmatpush.msra.mxu1 %v626_v62  ;;  %v847_v62 = vld [vmem:[%s1931_s7 + $0xe0] sm:$0xff] }
 0x168   : > { %1382 = vmatmul.msk.f32.gmra.mxu2 %vm646_vm7, %v621_v61  ;;  %872 = vmatpush.msra.mxu3 %v832_v59 }
 0x169   : > { %v622_v63 = vld [vmem:[#allocation3] sm:$0xff] }
 0x16a   : > { %678 = vmatpush.msra.mxu0 %v622_v63  ;;  %v623_v1 = vld [vmem:[#allocation3 + $0x8] sm:$0xff] }
 0x16b   : > { %701 = vmatpush.msra.mxu1 %v623_v1  ;;  %1375 = vmatmul.msk.f32.vlgmr.msra.gmra.mxu0 %vm646_vm7, %v620_v50  ;;  %v830_v63 = vld [vmem:[%s1931_s7 + $0x58] sm:$0xff] }
 0x16c   : > { %1378 = vmatmul.msk.f32.vlgmr.msra.gmra.mxu1 %vm646_vm7, %v620_v50  ;;  %893 = vmatpush.msrb.mxu0 %v850_v56  ;;  %v846_v1 = vld [vmem:[%s1931_s7 + $0xd8] sm:$0xff]  ;;  %v1079_v56 = vld [vmem:[%s1928_s4 + $0x10] sm:$0xff] }
 0x16d   : > { %1383 = vmatpush.msk.msrb.mxu1 %vm866_vm13, %v859_v28 }
 0x16e   : > { %894 = vmatpush.msrb.mxu0 %v849_v58 }
 0x16f   : > { %924 = vmatpush.msrb.mxu1 %v858_v29 }
 0x170   : > { %895 = vmatpush.msrb.mxu0 %v848_v60 }
 0x171   : > { %925 = vmatpush.msrb.mxu1 %v857_v30 }
 0x172   : > { %896 = vmatpush.msrb.mxu0 %v847_v62 }
 0x173   : > { %1376 = vmatmul.msk.f32.gmra.mxu0 %vm646_vm7, %v621_v61  ;;  %926 = vmatpush.msrb.mxu1 %v856_v31 }
 0x174   : > { %1379 = vmatmul.msk.f32.gmra.mxu1 %vm646_vm7, %v621_v61  ;;  %v831_v61 = vld [vmem:[%s1931_s7 + $0x60] sm:$0xff]  ;;  %897 = vmatpush.msrb.mxu0 %v846_v1 }
 0x175   : > { %927 = vmatpush.msrb.mxu1 %v855_v32  ;;  %873 = vmatpush.msra.mxu3 %v831_v61 }
 0x177   : > { %928 = vmatpush.msrb.mxu1 %v854_v33  ;;  %874 = vmatpush.msra.mxu3 %v830_v63 }
 0x179   : > { %929 = vmatpush.msrb.mxu1 %v853_v34 }
 0x17b   : > { %930 = vmatpush.msrb.mxu1 %v852_v35 }
 0x17d   : > { %931 = vmatpush.msrb.mxu1 %v851_v54 }
 0x1e3   : > { %v726_v3 = vpop.f32.mrf.mxu2 }
 0x1e4   : > { %v727_v4 = vadd.f32 %v726_v3, %v639_v2  ;;  %v845_v3 = vld [vmem:[%s1931_s7 + $0xd0] sm:$0xff] }
 0x1e5   : > { %898 = vmatpush.msrb.mxu0 %v845_v3 }
 0x1e6   : > { %v734_v5 = vmax.f32 %v727_v4, 0.0  ;;  %v828_v4 = vld [vmem:[%s1931_s7 + $0x48] sm:$0xff] }
 0x1e8   : > { %741 = vst.msk [vmem:[#allocation4 + $0x10] sm:$0xff] %vm740_vm12, %v734_v5  ;;  %v680_v6 = vpop.f32.mrf.mxu0  ;;  %v844_v5 = vld [vmem:[%s1931_s7 + $0xc8] sm:$0xff] }
 0x1e9   : > { %v681_v7 = vadd.f32 %v680_v6, %v639_v2  ;;  %v703_v8 = vpop.f32.mrf.mxu1  ;;  %v827_v6 = vld [vmem:[%s1931_s7 + $0x40] sm:$0xff]  ;;  %899 = vmatpush.msrb.mxu0 %v844_v5 }
 0x1ea   : > { %v704_v10 = vadd.f32 %v703_v8, %v639_v2  ;;  %v829_v2 = vld [vmem:[%s1931_s7 + $0x50] sm:$0xff]  ;;  %v826_v8 = vld [vmem:[%s1931_s7 + $0x38] sm:$0xff] }
 0x1eb   : > { %v732_v11 = vmax.f32 %v681_v7, 0.0  ;;  %v729_v12 = vpop.f32.mrf.mxu2  ;;  %875 = vmatpush.msra.mxu3 %v829_v2  ;;  %v843_v7 = vld [vmem:[%s1931_s7 + $0xc0] sm:$0xff] }
 0x1ec   : > { %v733_v13 = vmax.f32 %v704_v10, 0.0  ;;  %v730_v14 = vadd.f32 %v729_v12, %v644_v9  ;;  %900 = vmatpush.msrb.mxu0 %v843_v7  ;;  %v825_v10 = vld [vmem:[%s1931_s7 + $0x30] sm:$0xff]  ;;  %v824_v12 = vld [vmem:[%s1931_s7 + $0x28] sm:$0xff] }
 0x1ed   : > { %876 = vmatpush.msra.mxu3 %v828_v4 }
 0x1ee   : > { %v737_v15 = vmax.f32 %v730_v14, 0.0  ;;  %v1439_v16 = vpack.i.bf16 %v733_v13, %v732_v11  ;;  %v823_v14 = vld [vmem:[%s1931_s7 + $0x20] sm:$0xff] }
 0x1ef   : > { %v747_v17 = vld [vmem:[#allocation4 + $0x10] sm:$0xff]  ;;  %877 = vmatpush.msra.mxu3 %v827_v6 }
 0x1f0   : > { %744 = vst.msk [vmem:[#allocation4 + $0x28] sm:$0xff] %vm740_vm12, %v737_v15  ;;  %v683_v18 = vpop.f32.mrf.mxu0  ;;  %761 = vrot.lane.b32.xlu2 %v747_v17, %s1470_s16  ;;  %1440 = vrot.lane.b32.xlu1 %v1439_v16, %s1470_s16  ;;  %v839_v15 = vld [vmem:[%s1931_s7 + $0xa0] sm:$0xff]  ;;  %v822_v16 = vld [vmem:[%s1931_s7 + $0x18] sm:$0xff] }
 0x1f1   : > { %v684_v19 = vadd.f32 %v683_v18, %v644_v9  ;;  %v706_v20 = vpop.f32.mrf.mxu1  ;;  %878 = vmatpush.msra.mxu3 %v826_v8  ;;  %v821_v18 = vld [vmem:[%s1931_s7 + $0x10] sm:$0xff] }
 0x1f2   : > { %v707_v21 = vadd.f32 %v706_v20, %v644_v9  ;;  %v842_v9 = vld [vmem:[%s1931_s7 + $0xb8] sm:$0xff]  ;;  %v820_v20 = vld [vmem:[%s1931_s7 + $0x8] sm:$0xff] }
 0x1f3   : > { %v735_v22 = vmax.f32 %v684_v19, 0.0  ;;  %901 = vmatpush.msrb.mxu0 %v842_v9  ;;  %879 = vmatpush.msra.mxu3 %v825_v10  ;;  %v837_v19 = vld [vmem:[%s1931_s7 + $0x90] sm:$0xff] }
 0x1f4   : > { %v736_v23 = vmax.f32 %v707_v21, 0.0  ;;  %v836_v21 = vld [vmem:[%s1931_s7 + $0x88] sm:$0xff] }
 0x1f5   : > { %880 = vmatpush.msra.mxu3 %v824_v12  ;;  %v1078_v12 = vld [vmem:[%s1928_s4 + $0x8] sm:$0xff] }
 0x1f6   : > { %v1444_v24 = vpack.i.bf16 %v736_v23, %v735_v22 }
 0x1f7   : > { %v750_v25 = vld [vmem:[#allocation4 + $0x28] sm:$0xff]  ;;  %881 = vmatpush.msra.mxu3 %v823_v14 }
 0x1f8   : > { %767 = vrot.lane.b32.xlu2 %v750_v25, %s1470_s16  ;;  %1445 = vrot.lane.b32.xlu1 %v1444_v24, %s1470_s16 }
 0x1f9   : > { %882 = vmatpush.msra.mxu3 %v822_v16 }
 0x1fb   : > { %883 = vmatpush.msra.mxu3 %v821_v18 }
 0x1fd   : > { %884 = vmatpush.msra.mxu3 %v820_v20  ;;  %v1077_v20 = vld [vmem:[%s1928_s4] sm:$0xff] }
 0x24a   : > { %v762_v26 = vpop.permute.xlu2 %761 }
 0x24b   : > { %v1618_v27 = vmax.f32 %v747_v17, %v762_v26  ;;  %v838_v17 = vld [vmem:[%s1931_s7 + $0x98] sm:$0xff] }
 0x24d   : > { %795 = vrot.lane.b32.xlu1 %v1618_v27, %s1472_s18 }
 0x252   : > { %v768_v47 = vpop.permute.xlu2 %767 }
 0x253   : > { %v1662_v52 = vmax.f32 %v750_v25, %v768_v47  ;;  %v835_v25 = vld [vmem:[%s1931_s7 + $0x80] sm:$0xff] }
 0x262   : > { %v1441_v36 = vpop.permute.xlu1 %1440 }
 0x263   : > { %v1443_v37 = vunpack.i.h.bf16 %v1441_v36  ;;  %v1442_v38 = vunpack.i.l.bf16 %v1441_v36 }
 0x265   : > { %v769_v39 = vsel %vm405_vm10, %v1442_v38, %v1443_v37  ;;  %v770_v40 = vsel %vm405_vm10, %v1443_v37, %v762_v26 }
 0x266   : > { %v1649_v41 = vmax.f32 %v732_v11, %v769_v39  ;;  %v1651_v42 = vmax.f32 %v733_v13, %v770_v40  ;;  %v841_v11 = vld [vmem:[%s1931_s7 + $0xb0] sm:$0xff]  ;;  %v840_v13 = vld [vmem:[%s1931_s7 + $0xa8] sm:$0xff] }
 0x267   : > { %902 = vmatpush.msrb.mxu0 %v841_v11 }
 0x268   : > { %v1449_v43 = vpack.i.bf16 %v1651_v42, %v1649_v41 }
 0x269   : > { %903 = vmatpush.msrb.mxu0 %v840_v13 }
 0x26a   : > { %v1446_v44 = vpop.permute.xlu1 %1445  ;;  %1450 = vrot.lane.b32.xlu0 %v1449_v43, %s1472_s18 }
 0x26b   : > { %v1448_v45 = vunpack.i.h.bf16 %v1446_v44  ;;  %v1447_v46 = vunpack.i.l.bf16 %v1446_v44  ;;  %904 = vmatpush.msrb.mxu0 %v839_v15 }
 0x26d   : > { %v771_v48 = vsel %vm405_vm10, %v1447_v46, %v1448_v45  ;;  %v772_v49 = vsel %vm405_vm10, %v1448_v45, %v768_v47  ;;  %905 = vmatpush.msrb.mxu0 %v838_v17 }
 0x26e   : > { %v1658_v50 = vmax.f32 %v735_v22, %v771_v48  ;;  %v1660_v51 = vmax.f32 %v736_v23, %v772_v49  ;;  %v819_v23 = vld [vmem:[%s1931_s7] sm:$0xff] }
 0x26f   : > { %906 = vmatpush.msrb.mxu0 %v837_v19  ;;  %885 = vmatpush.msra.mxu3 %v819_v23 }
 0x270   : > { %v1454_v53 = vpack.i.bf16 %v1660_v51, %v1658_v50 }
 0x271   : > { %907 = vmatpush.msrb.mxu0 %v836_v21 }
 0x272   : > { %801 = vrot.lane.b32.xlu0 %v1662_v52, %s1472_s18  ;;  %1455 = vrot.lane.b32.xlu2 %v1454_v53, %s1472_s18 }
 0x273   : > { %908 = vmatpush.msrb.mxu0 %v835_v25 }
 0x2bf   : > { %v796_v22 = vpop.permute.xlu1 %795 }
 0x2c0   : > { %v815_v24 = vmax.f32 %v1618_v27, %v796_v22 }
 0x2c2   : > { %1384 = vmatmul.msk.f32.vlgmr.msrb.gmra.mxu1 %vm740_vm12, %v815_v24 }
 0x2cc   : > { %v1456_v30 = vpop.permute.xlu2 %1455 }
 0x2cd   : > { %v1458_v34 = vunpack.i.h.bf16 %v1456_v30  ;;  %v1457_v35 = vunpack.i.l.bf16 %v1456_v30  ;;  %v1051_v30 = vld [vmem:[%s1927_s3] sm:$0xff] }
 0x2cf   : > { %v805_v39 = vsel %vm467_vm15, %v1457_v35, %v1458_v34  ;;  %v1055_v35 = vld [vmem:[%s1927_s3 + $0x20] sm:$0xff] }
 0x2d0   : > { %v816_v40 = vmax.f32 %v1658_v50, %v805_v39 }
 0x2dc   : > { %v1451_v26 = vpop.permute.xlu0 %1450 }
 0x2dd   : > { %v1453_v28 = vunpack.i.h.bf16 %v1451_v26  ;;  %v1452_v29 = vunpack.i.l.bf16 %v1451_v26 }
 0x2df   : > { %v803_v31 = vsel %vm467_vm15, %v1452_v29, %v1453_v28  ;;  %v804_v32 = vsel %vm467_vm15, %v1453_v28, %v796_v22 }
 0x2e0   : > { %v813_v27 = vmax.f32 %v1649_v41, %v803_v31  ;;  %v814_v33 = vmax.f32 %v1651_v42, %v804_v32  ;;  %v1052_v32 = vld [vmem:[%s1927_s3 + $0x8] sm:$0xff] }
 0x2e2   : > { %886 = vmatmul.f32.vlgmr.msra.gmra.mxu3 %v813_v27  ;;  %909 = vmatmul.f32.vlgmr.msrb.gmra.mxu0 %v814_v33  ;;  %v1053_v33 = vld [vmem:[%s1927_s3 + $0x10] sm:$0xff] }
 0x2e4   : > { %v802_v36 = vpop.permute.xlu0 %801 }
 0x2e5   : > { %v806_v37 = vsel %vm467_vm15, %v1458_v34, %v802_v36  ;;  %v818_v38 = vmax.f32 %v1662_v52, %v802_v36  ;;  %vm947_vm15 = vcmask 908376   ;;  %v1054_v34 = vld [vmem:[%s1927_s3 + $0x18] sm:$0xff]  ;;  %v1056_v36 = vld [vmem:[%s1927_s3 + $0x28] sm:$0xff] }
 0x2e6   : > { %v817_v43 = vmax.f32 %v1660_v51, %v806_v37  ;;  %v1057_v37 = vld [vmem:[%s1927_s3 + $0x30] sm:$0xff] }
 0x2e7   : > { %1385 = vmatmul.msk.f32.gmra.mxu1 %vm740_vm12, %v818_v38  ;;  %v1058_v38 = vld [vmem:[%s1927_s3 + $0x38] sm:$0xff] }
 0x2ea   : > { %889 = vmatmul.f32.gmra.mxu3 %v816_v40  ;;  %912 = vmatmul.f32.gmra.mxu0 %v817_v43 }
 0x33f   : > { %v933_v45 = vpop.f32.mrf.mxu1 }
 0x35f   : > { %v910_v41 = vpop.f32.mrf.mxu0 }
 0x364   : > { %v936_v50 = vpop.f32.mrf.mxu1 }
 0x365   : > { %v887_v42 = vpop.f32.mrf.mxu3 }
 0x366   : > { %v911_v44 = vadd.f32 %v910_v41, %v887_v42 }
 0x367   : > { %v913_v47 = vpop.f32.mrf.mxu0 }
 0x368   : > { %v934_v46 = vadd.f32 %v933_v45, %v911_v44 }
 0x36a   : > { %941 = vrot.lane.b32.xlu2 %v934_v46, %s1479_s19 }
 0x36d   : > { %v890_v48 = vpop.f32.mrf.mxu3 }
 0x36e   : > { %v914_v49 = vadd.f32 %v913_v47, %v890_v48 }
 0x370   : > { %v937_v51 = vadd.f32 %v936_v50, %v914_v49 }
 0x372   : > { %943 = vrot.lane.b32.xlu1 %v937_v51, %s1479_s19 }
 0x3c4   : > { %v942_v52 = vpop.permute.xlu2 %941 }
 0x3c5   : > { %948 = vst.msk [vmem:[#allocation5] sm:$0xff] %vm947_vm15, %v942_v52 }
 0x3cc   : > { %v1015_v53 = vld [vmem:[#allocation5] sm:$0xff] }
 0x3cd   : > { %1019 = vrot.lane.b32.xlu0 %v1015_v53, %s1474_s20  ;;  %1031 = vrot.lane.b32.xlu1 %v1015_v53, %s1480_s21  ;;  %953 = vst.msk [vmem:[#allocation6] sm:$0xff] %vm952_vm1, %v1015_v53 }
 0x3d4   : > { %v1059_v31 = vld [vmem:[#allocation6] sm:$0xff] }
 0x3e4   : > { %v944_v54 = vpop.permute.xlu1 %943 }
 0x3e5   : > { %949 = vst.msk [vmem:[#allocation5 + $0x8] sm:$0xff] %vm947_vm15, %v944_v54 }
 0x3ec   : > { %v1028_v55 = vld [vmem:[#allocation5 + $0x8] sm:$0xff] }
 0x3ed   : > { %1033 = vrot.lane.b32.xlu0 %v1028_v55, %s1480_s21  ;;  %1021 = vrot.lane.b32.xlu2 %v1028_v55, %s1474_s20  ;;  %954 = vst.msk [vmem:[#allocation6 + $0x8] sm:$0xff] %vm952_vm1, %v1028_v55  ;;  %s1484_s20 = smov 106  }
 0x3ee   : > { %1009 = vrot.lane.b32.xlu1 %v1028_v55, %s1481_s22 }
 0x3f4   : > { %v1060_v29 = vld [vmem:[#allocation6 + $0x8] sm:$0xff] }
 0x3f5   : > { %1007 = vrot.lane.b32.xlu2 %v1015_v53, %s1481_s22  ;;  %997 = vrot.lane.b32.xlu0 %v1028_v55, %s1482_s23 }
 0x3f6   : > { %995 = vrot.lane.b32.xlu1 %v1015_v53, %s1482_s23 }
 0x3fd   : > { %983 = vrot.lane.b32.xlu0 %v1015_v53, %s1483_s24  ;;  %985 = vrot.lane.b32.xlu2 %v1028_v55, %s1483_s24 }
 0x3fe   : > { %973 = vrot.lane.b32.xlu1 %v1028_v55, %s1471_s17 }
 0x405   : > { %971 = vrot.lane.b32.xlu2 %v1015_v53, %s1471_s17  ;;  %961 = vrot.lane.b32.xlu0 %v1028_v55, %s1470_s16 }
 0x406   : > { %959 = vrot.lane.b32.xlu1 %v1015_v53, %s1470_s16 }
 0x40d   : > { %1045 = vrot.lane.b32.xlu2 %v1028_v55, %s1484_s20  ;;  %1043 = vrot.lane.b32.xlu0 %v1015_v53, %s1484_s20 }
 0x40e   : > { %1088 = vperm.xlu1 %1459, %v1078_v12   ;;  %v1231_v12 = vld [vmem:[%s1932_s8 + $0x38] sm:$0xff] }
 0x415   : > { %1093 = vperm.xlu2 %1437, %v1079_v56   ;;  %1098 = vperm.xlu0 %1438, %v1080_v57  }
 0x416   : > { %1083 = vperm.xlu1 %1459, %v1077_v20  }
 0x43f   : > { %v1020_v58 = vpop.permute.xlu0 %1019  ;;  %v1032_v59 = vpop.permute.xlu1 %1031 }
 0x440   : > { %1025 = vst.msk [vmem:[#allocation6 + $0x60] sm:$0xff] %vm952_vm1, %v1020_v58 }
 0x441   : > { %1037 = vst.msk [vmem:[#allocation6 + $0x70] sm:$0xff] %vm952_vm1, %v1032_v59 }
 0x447   : > { %v1022_v60 = vpop.permute.xlu2 %1021  ;;  %v1071_v9 = vld [vmem:[#allocation6 + $0x60] sm:$0xff] }
 0x448   : > { %1026 = vst.msk [vmem:[#allocation6 + $0x68] sm:$0xff] %vm952_vm1, %v1022_v60  ;;  %v1073_v7 = vld [vmem:[#allocation6 + $0x70] sm:$0xff] }
 0x44f   : > { %v1008_v61 = vpop.permute.xlu2 %1007  ;;  %v1072_v8 = vld [vmem:[#allocation6 + $0x68] sm:$0xff] }
 0x450   : > { %1013 = vst.msk [vmem:[#allocation6 + $0x50] sm:$0xff] %vm952_vm1, %v1008_v61 }
 0x457   : > { %v986_v62 = vpop.permute.xlu2 %985  ;;  %v1069_v15 = vld [vmem:[#allocation6 + $0x50] sm:$0xff] }
 0x458   : > { %990 = vst.msk [vmem:[#allocation6 + $0x38] sm:$0xff] %vm952_vm1, %v986_v62 }
 0x45f   : > { %v1034_v63 = vpop.permute.xlu0 %1033  ;;  %v972_v1 = vpop.permute.xlu2 %971  ;;  %v1066_v19 = vld [vmem:[#allocation6 + $0x38] sm:$0xff] }
 0x460   : > { %1038 = vst.msk [vmem:[#allocation6 + $0x78] sm:$0xff] %vm952_vm1, %v1034_v63  ;;  %v1010_v2 = vpop.permute.xlu1 %1009 }
 0x461   : > { %977 = vst.msk [vmem:[#allocation6 + $0x20] sm:$0xff] %vm952_vm1, %v972_v1 }
 0x462   : > { %1014 = vst.msk [vmem:[#allocation6 + $0x58] sm:$0xff] %vm952_vm1, %v1010_v2 }
 0x467   : > { %v998_v3 = vpop.permute.xlu0 %997  ;;  %v1046_v4 = vpop.permute.xlu2 %1045  ;;  %v1074_v5 = vld [vmem:[#allocation6 + $0x78] sm:$0xff] }
 0x468   : > { %1002 = vst.msk [vmem:[#allocation6 + $0x48] sm:$0xff] %vm952_vm1, %v998_v3  ;;  %v996_v6 = vpop.permute.xlu1 %995  ;;  %1114 = vmatpush.msrb.mxu2 %v1074_v5  ;;  %v1063_v24 = vld [vmem:[#allocation6 + $0x20] sm:$0xff] }
 0x469   : > { %1050 = vst.msk [vmem:[#allocation6 + $0x88] sm:$0xff] %vm952_vm1, %v1046_v4  ;;  %v1070_v11 = vld [vmem:[#allocation6 + $0x58] sm:$0xff] }
 0x46a   : > { %1001 = vst.msk [vmem:[#allocation6 + $0x40] sm:$0xff] %vm952_vm1, %v996_v6  ;;  %1115 = vmatpush.msrb.mxu2 %v1073_v7  ;;  %v1236_v7 = vld [vmem:[%s1932_s8 + $0x60] sm:$0xf] }
 0x46b   : > { %1398 = vmatpush.msk.msrb.mxu3 %vm866_vm13, %v1236_v7 }
 0x46c   : > { %1116 = vmatpush.msrb.mxu2 %v1072_v8  ;;  %v1235_v8 = vld [vmem:[%s1932_s8 + $0x58] sm:$0xff] }
 0x46d   : > { %1399 = vmatpush.msrb.mxu3 %v1235_v8 }
 0x46e   : > { %1117 = vmatpush.msrb.mxu2 %v1071_v9  ;;  %v1234_v9 = vld [vmem:[%s1932_s8 + $0x50] sm:$0xff] }
 0x46f   : > { %v984_v10 = vpop.permute.xlu0 %983  ;;  %v1068_v16 = vld [vmem:[#allocation6 + $0x48] sm:$0xff]  ;;  %v1094_v52 = vpop.permute.xlu2 %1093  ;;  %1400 = vmatpush.msrb.mxu3 %v1234_v9 }
 0x470   : > { %989 = vst.msk [vmem:[#allocation6 + $0x30] sm:$0xff] %vm952_vm1, %v984_v10  ;;  %v974_v13 = vpop.permute.xlu1 %973  ;;  %1118 = vmatpush.msrb.mxu2 %v1070_v11  ;;  %v1076_v14 = vld [vmem:[#allocation6 + $0x88] sm:$0xff]  ;;  %v1233_v10 = vld [vmem:[%s1932_s8 + $0x48] sm:$0xff] }
 0x471   : > { %978 = vst.msk [vmem:[#allocation6 + $0x28] sm:$0xff] %vm952_vm1, %v974_v13  ;;  %1157 = vmatpush.msra.mxu1 %v1076_v14  ;;  %v1067_v17 = vld [vmem:[#allocation6 + $0x40] sm:$0xff]  ;;  %v1232_v11 = vld [vmem:[%s1932_s8 + $0x40] sm:$0xff]  ;;  %1401 = vmatpush.msrb.mxu3 %v1233_v10  ;;  %v1229_v14 = vld [vmem:[%s1932_s8 + $0x28] sm:$0xff] }
 0x472   : > { %1119 = vmatpush.msrb.mxu2 %v1069_v15  ;;  %v1230_v13 = vld [vmem:[%s1932_s8 + $0x30] sm:$0xff]  ;;  %v1228_v15 = vld [vmem:[%s1932_s8 + $0x20] sm:$0xff] }
 0x473   : > { %1402 = vmatpush.msrb.mxu3 %v1232_v11 }
 0x474   : > { %1120 = vmatpush.msrb.mxu2 %v1068_v16  ;;  %v1227_v16 = vld [vmem:[%s1932_s8 + $0x18] sm:$0xff] }
 0x475   : > { %1403 = vmatpush.msrb.mxu3 %v1231_v12 }
 0x476   : > { %1121 = vmatpush.msrb.mxu2 %v1067_v17  ;;  %v1226_v17 = vld [vmem:[%s1932_s8 + $0x10] sm:$0xff] }
 0x477   : > { %v962_v18 = vpop.permute.xlu0 %961  ;;  %v1065_v22 = vld [vmem:[#allocation6 + $0x30] sm:$0xff]  ;;  %1404 = vmatpush.msrb.mxu3 %v1230_v13 }
 0x478   : > { %966 = vst.msk [vmem:[#allocation6 + $0x18] sm:$0xff] %vm952_vm1, %v962_v18  ;;  %v960_v21 = vpop.permute.xlu1 %959  ;;  %1122 = vmatpush.msrb.mxu2 %v1066_v19  ;;  %v1064_v23 = vld [vmem:[#allocation6 + $0x28] sm:$0xff]  ;;  %v1225_v18 = vld [vmem:[%s1932_s8 + $0x8] sm:$0xff] }
 0x479   : > { %965 = vst.msk [vmem:[#allocation6 + $0x10] sm:$0xff] %vm952_vm1, %v960_v21  ;;  %1405 = vmatpush.msrb.mxu3 %v1229_v14 }
 0x47a   : > { %1123 = vmatpush.msrb.mxu2 %v1065_v22  ;;  %v1282_v22 = vld [vmem:[%s1930_s6] sm:$0x3f] }
 0x47b   : > { %1406 = vmatpush.msrb.mxu3 %v1228_v15 }
 0x47c   : > { %1124 = vmatpush.msrb.mxu2 %v1064_v23 }
 0x47d   : > { %1407 = vmatpush.msrb.mxu3 %v1227_v16 }
 0x47e   : > { %1125 = vmatpush.msrb.mxu2 %v1063_v24  ;;  %v1224_v24 = vld [vmem:[%s1932_s8] sm:$0xff] }
 0x47f   : > { %v1044_v25 = vpop.permute.xlu0 %1043  ;;  %v1062_v26 = vld [vmem:[#allocation6 + $0x18] sm:$0xff]  ;;  %1408 = vmatpush.msrb.mxu3 %v1226_v17 }
 0x480   : > { %1049 = vst.msk [vmem:[#allocation6 + $0x80] sm:$0xff] %vm952_vm1, %v1044_v25  ;;  %1126 = vmatpush.msrb.mxu2 %v1062_v26  ;;  %v1061_v28 = vld [vmem:[#allocation6 + $0x10] sm:$0xff]  ;;  %v1089_v39 = vpop.permute.xlu1 %1088 }
 0x481   : > { %1409 = vmatpush.msrb.mxu3 %v1225_v18 }
 0x482   : > { %1127 = vmatpush.msrb.mxu2 %v1061_v28 }
 0x483   : > { %1410 = vmatpush.msrb.mxu3 %v1224_v24 }
 0x484   : > { %1128 = vmatpush.msrb.mxu2 %v1060_v29 }
 0x486   : > { %1129 = vmatpush.msrb.mxu2 %v1059_v31 }
 0x487   : > { %1130 = vmatmul.f32.vlgmr.msrb.gmra.mxu2 %v1051_v30  ;;  %v1075_v27 = vld [vmem:[#allocation6 + $0x80] sm:$0xff]  ;;  %v1099_v57 = vpop.permute.xlu0 %1098 }
 0x488   : > { %1158 = vmatpush.msra.mxu1 %v1075_v27  ;;  %v1084_v43 = vpop.permute.xlu1 %1083  ;;  %1390 = vmatpush.msk.msra.mxu2 %vm866_vm13, %v1236_v7 }
 0x489   : > { %1386 = vmatmul.msk.f32.vlgmr.msra.gmra.mxu1 %vm1101_vm2, %v1052_v32 }
 0x48a   : > { %1256 = vmatpush.msra.mxu2 %v1235_v8 }
 0x48c   : > { %1257 = vmatpush.msra.mxu2 %v1234_v9 }
 0x48e   : > { %1258 = vmatpush.msra.mxu2 %v1233_v10 }
 0x48f   : > { %1133 = vmatmul.f32.gmra.mxu2 %v1053_v33 }
 0x490   : > { %1259 = vmatpush.msra.mxu2 %v1232_v11 }
 0x491   : > { %1387 = vmatmul.msk.f32.gmra.mxu1 %vm1101_vm2, %v1054_v34 }
 0x492   : > { %1260 = vmatpush.msra.mxu2 %v1231_v12 }
 0x494   : > { %1261 = vmatpush.msra.mxu2 %v1230_v13 }
 0x496   : > { %1262 = vmatpush.msra.mxu2 %v1229_v14 }
 0x497   : > { %1136 = vmatmul.f32.gmra.mxu2 %v1055_v35 }
 0x498   : > { %1263 = vmatpush.msra.mxu2 %v1228_v15 }
 0x499   : > { %1388 = vmatmul.msk.f32.gmra.mxu1 %vm1101_vm2, %v1056_v36  ;;  %v1281_v36 = vld [vmem:[%s1929_s5] sm:$0x3f] }
 0x49a   : > { %1264 = vmatpush.msra.mxu2 %v1227_v16 }
 0x49c   : > { %1265 = vmatpush.msra.mxu2 %v1226_v17 }
 0x49e   : > { %1266 = vmatpush.msra.mxu2 %v1225_v18 }
 0x49f   : > { %1139 = vmatmul.f32.gmra.mxu2 %v1057_v37 }
 0x4a0   : > { %1267 = vmatpush.msra.mxu2 %v1224_v24 }
 0x4a1   : > { %1389 = vmatmul.msk.f32.gmra.mxu1 %vm1101_vm2, %v1058_v38 }
 0x506   : > { %v1160_v40 = vpop.f32.mrf.mxu1 }
 0x50a   : > { %v1131_v41 = vpop.f32.mrf.mxu2 }
 0x50b   : > { %v1132_v42 = vadd.f32 %v1131_v41, %v1084_v43 }
 0x50d   : > { %v1161_v44 = vadd.f32 %v1160_v40, %v1132_v42 }
 0x50e   : > { %v1163_v45 = vpop.f32.mrf.mxu1 }
 0x50f   : > { %v1172_v46 = vmax.f32 %v1161_v44, 0.0 }
 0x511   : > { %1176 = vst.msk [vmem:[#allocation7] sm:$0xff] %vm952_vm1, %v1172_v46 }
 0x512   : > { %v1134_v47 = vpop.f32.mrf.mxu2 }
 0x513   : > { %v1135_v48 = vadd.f32 %v1134_v47, %v1089_v39 }
 0x515   : > { %v1164_v49 = vadd.f32 %v1163_v45, %v1135_v48 }
 0x516   : > { %v1166_v51 = vpop.f32.mrf.mxu1 }
 0x517   : > { %v1173_v50 = vmax.f32 %v1164_v49, 0.0 }
 0x518   : > { %v1180_v1 = vld [vmem:[#allocation7] sm:$0xff] }
 0x519   : > { %1177 = vst.msk [vmem:[#allocation7 + $0x8] sm:$0xff] %vm952_vm1, %v1173_v50 }
 0x51a   : > { %v1137_v53 = vpop.f32.mrf.mxu2 }
 0x51b   : > { %v1138_v0 = vadd.f32 %v1137_v53, %v1094_v52 }
 0x51d   : > { %v1167_v54 = vadd.f32 %v1166_v51, %v1138_v0 }
 0x51e   : > { %v1169_v59 = vpop.f32.mrf.mxu1 }
 0x51f   : > { %v1174_v55 = vmax.f32 %v1167_v54, 0.0 }
 0x520   : > { %v1181_v56 = vld [vmem:[#allocation7 + $0x8] sm:$0xff] }
 0x521   : > { %1178 = vst.msk [vmem:[#allocation7 + $0x10] sm:$0xff] %vm952_vm1, %v1174_v55  ;;  %1190 = vrot.lane.b32.xlu2 %v1181_v56, %s1470_s16 }
 0x522   : > { %v1140_v58 = vpop.f32.mrf.mxu2 }
 0x523   : > { %v1141_v60 = vadd.f32 %v1140_v58, %v1099_v57 }
 0x525   : > { %v1170_v61 = vadd.f32 %v1169_v59, %v1141_v60 }
 0x527   : > { %v1175_v62 = vmax.f32 %v1170_v61, 0.0 }
 0x528   : > { %v1182_v63 = vld [vmem:[#allocation7 + $0x10] sm:$0xff] }
 0x529   : > { %1179 = vst.msk [vmem:[#allocation7 + $0x18] sm:$0xff] %vm952_vm1, %v1175_v62  ;;  %1192 = vrot.lane.b32.xlu0 %v1182_v63, %s1470_s16  ;;  %1188 = vrot.lane.b32.xlu2 %v1180_v1, %s1470_s16 }
 0x530   : > { %v1183_v2 = vld [vmem:[#allocation7 + $0x18] sm:$0xff] }
 0x531   : > { %1194 = vrot.lane.b32.xlu1 %v1183_v2, %s1470_s16 }
 0x57b   : > { %v1191_v3 = vpop.permute.xlu2 %1190 }
 0x57c   : > { %v1201_v4 = vmax.f32 %v1181_v56, %v1191_v3 }
 0x57e   : > { %1210 = vrot.lane.b32.xlu0 %v1201_v4, %s1483_s24 }
 0x583   : > { %v1189_v5 = vpop.permute.xlu2 %1188 }
 0x584   : > { %v1200_v6 = vmax.f32 %v1180_v1, %v1189_v5 }
 0x586   : > { %1208 = vrot.lane.b32.xlu0 %v1200_v6, %s1483_s24 }
 0x59b   : > { %v1193_v19 = vpop.permute.xlu0 %1192 }
 0x59c   : > { %v1202_v20 = vmax.f32 %v1182_v63, %v1193_v19 }
 0x59e   : > { %1212 = vrot.lane.b32.xlu1 %v1202_v20, %s1483_s24 }
 0x5a3   : > { %v1195_v21 = vpop.permute.xlu1 %1194 }
 0x5a4   : > { %v1203_v23 = vmax.f32 %v1183_v2, %v1195_v21 }
 0x5a6   : > { %1285 = vperm.xlu1 %1459, %v1282_v22   ;;  %1214 = vrot.lane.b32.xlu2 %v1203_v23, %s1483_s24 }
 0x5f0   : > { %v1211_v25 = vpop.permute.xlu0 %1210 }
 0x5f1   : > { %v1221_v26 = vmax.f32 %v1201_v4, %v1211_v25 }
 0x5f3   : > { %1392 = vmatmul.msk.f32.vlgmr.msrb.gmra.mxu3 %vm952_vm1, %v1221_v26 }
 0x5f8   : > { %v1209_v28 = vpop.permute.xlu0 %1208 }
 0x5f9   : > { %v1220_v29 = vmax.f32 %v1200_v6, %v1209_v28 }
 0x5fb   : > { %1391 = vmatmul.msk.f32.vlgmr.msra.gmra.mxu2 %vm952_vm1, %v1220_v29 }
 0x600   : > { %v1215_v32 = vpop.permute.xlu2 %1214 }
 0x601   : > { %v1223_v27 = vmax.f32 %v1203_v23, %v1215_v32 }
 0x610   : > { %v1213_v30 = vpop.permute.xlu1 %1212 }
 0x611   : > { %v1222_v31 = vmax.f32 %v1202_v20, %v1213_v30 }
 0x613   : > { %1393 = vmatmul.msk.f32.gmra.mxu3 %vm952_vm1, %v1222_v31 }
 0x618   : > { %v1286_v38 = vpop.permute.xlu1 %1285 }
 0x61b   : > { %1394 = vmatmul.msk.f32.gmra.mxu3 %vm952_vm1, %v1223_v27 }
 0x676   : > { %v1272_v33 = vpop.f32.mrf.mxu3 }
 0x67e   : > { %v1269_v37 = vpop.f32.mrf.mxu2 }
 0x696   : > { %v1275_v34 = vpop.f32.mrf.mxu3 }
 0x69e   : > { %v1278_v35 = vpop.f32.mrf.mxu3 }
 0x69f   : > { %1304 = vmatpush.msra.mxu0 %v1278_v35 }
 0x6a1   : > { %1305 = vmatpush.msra.mxu0 %v1275_v34 }
 0x6a3   : > { %1306 = vmatpush.msra.mxu0 %v1272_v33 }
 0x6a5   : > { %1307 = vmatpush.msra.mxu0 %v1269_v37 }
 0x6a6   : > { %1395 = vmatmul.msk.f32.vlgmr.msra.gmra.mxu0 %vm1288_vm4, %v1281_v36 }
 0x723   : > { %v1309_v39 = vpop.f32.mrf.mxu0 }
 0x724   : > { %v1310_v40 = vadd.f32 %v1309_v39, %v1286_v38 }
 0x726   : > { %1313 = vst.msk [vmem:[%s330_s27] sm:$0x3f] %vm1312_vm5, %v1310_v40 }
 0x727 PF: > { %s19_s30 = sadd.s32 1, %s1466_s30  }
 0x728   : > { %p16_p4 = scmp.ge.s32.totalorder %s19_s30, 4  }
 0x72a   :  { %18 = sbr.rel (!%p16_p4) target bundleno = 1 (0x1), region = 96 }

</bundles_post_ra>
